<compile_context>
chip_gen: v7x
topology: tpu7x:2x2x1
jax: 0.10.0
libtpu: 0.0.40
codegen_flags: <defaults>
</compile_context>

<pallas_src>
import functools

import jax
import jax.numpy as jnp
from jax.experimental import pallas as pl
from jax.experimental.pallas import tpu as pltpu


BN_EPS = 1e-5
LAYER_N = 8  # TableMLP.LAYER_N -> encoder = 1 + LAYER_N LinearBNAct blocks


# --------------------------------------------------------------------------- #
# Single fused kernel: 9 x (Linear -> BN -> ReLU) followed by fc (+bias).
# No grid: everything is a single VMEM-resident block (one launch, one
# writeback).  Layer loop is fully unrolled with static indices.
# --------------------------------------------------------------------------- #
def _table_mlp_kernel(x_ref, w_ref, g_ref, b_ref, wfc_ref, bfc_ref, o_ref):
    # x_ref:   (N, D)        input, zero-padded in features to emb_dim, f32
    # w_ref:   (L, D, D)     stacked pre-transposed encoder weights, bf16
    # g_ref:   (L, 1, D)     BN gamma per layer, f32
    # b_ref:   (L, 1, D)     BN beta per layer, f32
    # wfc_ref: (D, C_pad)    fc weight (transposed, lane-padded), bf16
    # bfc_ref: (1, C_pad)    fc bias (lane-padded), f32
    # o_ref:   (N, C_pad)    logits (lane-dense store), f32
    num_layers = w_ref.shape[0]

    act = x_ref[...]  # (N, D) f32 running activation (loop-carried value)

    for layer in range(num_layers):  # fully unrolled; static VMEM slices
        # Linear (bias=False): bf16 MXU operands, f32 accumulation.
        y = jnp.dot(act.astype(jnp.bfloat16), w_ref[layer],
                    preferred_element_type=jnp.float32)            # (N, D)
        # BatchNorm1d, training-mode whole-batch stats, centered variance.
        mean = jnp.mean(y, axis=0, keepdims=True)                   # (1, D)
        cent = y - mean
        var = jnp.mean(cent * cent, axis=0, keepdims=True)          # (1, D)
        scale = g_ref[layer] * jax.lax.rsqrt(var + BN_EPS)          # (1, D)
        # Dropout(p=0) is identity; activation = ReLU.
        act = jnp.maximum(cent * scale + b_ref[layer], 0.0)

    # Fused final fc: nn.Linear(emb_dim, n_classes) with bias.
    logits = jnp.dot(act.astype(jnp.bfloat16), wfc_ref[...],
                     preferred_element_type=jnp.float32) + bfc_ref[...]
    o_ref[...] = logits.astype(o_ref.dtype)


def _vmem_limit_bytes(working_set_bytes):
    """Exact working set + headroom, capped at this generation's physical VMEM."""
    try:
        physical = int(pltpu.get_tpu_info().vmem_capacity_bytes)
    except Exception:  # conservative fallback: v7x has the smallest VMEM (64 MiB/TC)
        physical = 64 << 20
    cap = physical - (8 << 20)
    if working_set_bytes > cap:
        # TODO(synk): add a layer-grid + batch-tiled (streaming-BN) variant for
        # configs whose working set exceeds physical VMEM.
        raise NotImplementedError(
            f"working set {working_set_bytes} B exceeds VMEM cap {cap} B")
    want = max(2 * working_set_bytes + (2 << 20), 16 << 20)
    return int(min(want, cap))


def _table_mlp_fused(x_pad, w_stack, g_stack, b_stack, w_fc_t_pad, b_fc_pad):
    n, d = x_pad.shape
    num_layers = w_stack.shape[0]
    c_pad = w_fc_t_pad.shape[1]

    resident = (
        n * d * 4                      # x
        + num_layers * d * d * 2       # encoder weights (bf16)
        + 2 * num_layers * d * 4       # gamma / beta
        + d * c_pad * 2                # fc weight (bf16)
        + c_pad * 4                    # fc bias
        + n * c_pad * 4                # logits
    )
    transient = 3 * n * d * 4 + n * c_pad * 4  # y / centered / act temporaries
    vmem_limit = _vmem_limit_bytes(resident + transient)

    vmem = pltpu.MemorySpace.VMEM
    return pl.pallas_call(
        _table_mlp_kernel,
        out_shape=jax.ShapeDtypeStruct((n, c_pad), jnp.float32),
        in_specs=[pl.BlockSpec(memory_space=vmem)] * 6,
        out_specs=pl.BlockSpec(memory_space=vmem),
        compiler_params=pltpu.CompilerParams(vmem_limit_bytes=vmem_limit),
    )(x_pad, w_stack, g_stack, b_stack, w_fc_t_pad, b_fc_pad)


# --------------------------------------------------------------------------- #
# Parameter prep (once, outside the per-call path): transpose, pad, stack,
# and cast matmul weights to bf16.
# --------------------------------------------------------------------------- #
def prepare_table_mlp_params(weights, gammas, betas, w_fc, b_fc):
    """weights[i]: (out, in) PyTorch layout; gammas/betas: (emb,); w_fc: (C, emb)."""
    emb_dim = weights[0].shape[0]
    in_dim = weights[0].shape[1]
    assert emb_dim % 128 == 0, "emb_dim must be a multiple of 128 (lane-dense tiles)"
    assert in_dim <= emb_dim, "first-layer in_features must be <= emb_dim"
    num_layers = len(weights)

    # Layer 0 weight: transpose to (in, emb) and zero-pad K up to emb_dim.
    w0 = jnp.zeros((emb_dim, emb_dim), jnp.float32).at[:in_dim, :].set(weights[0].T)
    w_stack = jnp.stack([w0] + [w.T.astype(jnp.float32) for w in weights[1:]], axis=0)
    w_stack = w_stack.astype(jnp.bfloat16)  # MXU-native input dtype on v5e/v6e/v7x
    g_stack = jnp.stack(gammas).astype(jnp.float32).reshape(num_layers, 1, emb_dim)
    b_stack = jnp.stack(betas).astype(jnp.float32).reshape(num_layers, 1, emb_dim)

    n_classes = w_fc.shape[0]
    c_pad = ((n_classes + 127) // 128) * 128
    w_fc_t_pad = (
        jnp.zeros((emb_dim, c_pad), jnp.float32)
        .at[:, :n_classes].set(w_fc.T)
        .astype(jnp.bfloat16)
    )
    b_fc_pad = jnp.zeros((1, c_pad), jnp.float32).at[0, :n_classes].set(b_fc)
    return w_stack, g_stack, b_stack, w_fc_t_pad, b_fc_pad


@functools.partial(jax.jit, static_argnames=("n_classes",))
def table_mlp_forward(x, w_stack, g_stack, b_stack, w_fc_t_pad, b_fc_pad, *, n_classes):
    n, in_dim = x.shape
    emb_dim = w_stack.shape[1]
    # Zero-pad input features to emb_dim so layer 0 uses the same tile shape.
    x_pad = jnp.zeros((n, emb_dim), jnp.float32).at[:, :in_dim].set(
        x.astype(jnp.float32))
    logits_pad = _table_mlp_fused(
        x_pad, w_stack, g_stack, b_stack, w_fc_t_pad, b_fc_pad)  # (N, C_pad)
    return logits_pad[:, :n_classes]


# --------------------------------------------------------------------------- #
# Pure-JAX references (PyTorch semantics).  `match_kernel_dtypes=True` mirrors
# the kernel's bf16 matmul operands / f32 accumulation for a tight check.
# --------------------------------------------------------------------------- #
def _reference_forward(x, weights, gammas, betas, w_fc, b_fc, *,
                       match_kernel_dtypes=False):
    def mm(a, w_t):
        if match_kernel_dtypes:
            return jnp.dot(a.astype(jnp.bfloat16), w_t.astype(jnp.bfloat16),
                           preferred_element_type=jnp.float32)
        return jnp.dot(a, w_t, preferred_element_type=jnp.float32)

    h = x
    for w, g, b in zip(weights, gammas, betas):
        y = mm(h, w.T)
        mean = jnp.mean(y, axis=0, keepdims=True)
        var = jnp.mean((y - mean) ** 2, axis=0, keepdims=True)
        h = jnp.maximum((y - mean) * jax.lax.rsqrt(var + BN_EPS) * g + b, 0.0)
    return mm(h, w_fc.T) + b_fc


if __name__ == "__main__":
    # Small-but-faithful TableMLP config: inputDimension=27 (spec default),
    # embDimension=128 (lane-dense), n_classes=10, batch=16, 1 + LAYER_N layers.
    N, IN_DIM, EMB_DIM, N_CLASSES = 16, 27, 128, 10
    num_layers = 1 + LAYER_N

    key = jax.random.PRNGKey(0)
    keys = jax.random.split(key, 3 * num_layers + 4)

    weights, gammas, betas = [], [], []
    for i in range(num_layers):
        fan_in = IN_DIM if i == 0 else EMB_DIM
        bound = 1.0 / jnp.sqrt(fan_in)
        weights.append(
            jax.random.uniform(keys[3 * i], (EMB_DIM, fan_in), jnp.float32, -bound, bound)
        )
        gammas.append(1.0 + 0.1 * jax.random.normal(keys[3 * i + 1], (EMB_DIM,), jnp.float32))
        betas.append(0.05 * jax.random.normal(keys[3 * i + 2], (EMB_DIM,), jnp.float32))

    fc_bound = 1.0 / jnp.sqrt(EMB_DIM)
    w_fc = jax.random.uniform(keys[-4], (N_CLASSES, EMB_DIM), jnp.float32, -fc_bound, fc_bound)
    b_fc = jax.random.uniform(keys[-3], (N_CLASSES,), jnp.float32, -fc_bound, fc_bound)
    x = jax.random.normal(keys[-2], (N, IN_DIM), dtype=jnp.float32)

    params = prepare_table_mlp_params(weights, gammas, betas, w_fc, b_fc)
    out = table_mlp_forward(x, *params, n_classes=N_CLASSES)
    out = jax.block_until_ready(out)
    assert out.shape == (N, N_CLASSES), out.shape

    # Tight check against a reference with matched (bf16-operand) numerics.
    ref_match = _reference_forward(x, weights, gammas, betas, w_fc, b_fc,
                                   match_kernel_dtypes=True)
    err_match = float(jnp.max(jnp.abs(out - ref_match)))
    assert jnp.allclose(out, ref_match, atol=2e-3, rtol=2e-3), (
        "mismatch vs bf16-matched reference: max abs diff = %s" % err_match)

    # Looser check against the full-f32 PyTorch-semantics reference (the only
    # intended deviation is the bf16 MXU operand quantization).
    ref_f32 = _reference_forward(x, weights, gammas, betas, w_fc, b_fc,
                                 match_kernel_dtypes=False)
    err_f32 = float(jnp.max(jnp.abs(out - ref_f32)))
    assert jnp.allclose(out, ref_f32, atol=5e-2, rtol=5e-2), (
        "mismatch vs f32 reference: max abs diff = %s" % err_f32)

    print("KERNEL_OK")
</pallas_src>

<mosaic_0001>
module attributes {stable_mosaic.version = 11 : i64} {
  func.func @_table_mlp_kernel(%arg0: memref<16x128xf32, #tpu.memory_space<vmem>>, %arg1: memref<9x128x128xbf16, #tpu.memory_space<vmem>>, %arg2: memref<9x1x128xf32, #tpu.memory_space<vmem>>, %arg3: memref<9x1x128xf32, #tpu.memory_space<vmem>>, %arg4: memref<128x128xbf16, #tpu.memory_space<vmem>>, %arg5: memref<1x128xf32, #tpu.memory_space<vmem>>, %arg6: memref<16x128xf32, #tpu.memory_space<vmem>>) attributes {dimension_semantics = [], scalar_prefetch = 0 : i64, scratch_operands = 0 : i64, tpu.core_type = #tpu.core_type<tc>} {
    %c0 = arith.constant 0 : index
    %c0_0 = arith.constant 0 : index
    %0 = vector.load %arg0[%c0, %c0_0] : memref<16x128xf32, #tpu.memory_space<vmem>>, vector<16x128xf32>
    %1 = arith.truncf %0 : vector<16x128xf32> to vector<16x128xbf16>
    %c0_1 = arith.constant 0 : index
    %c0_2 = arith.constant 0 : index
    %c0_3 = arith.constant 0 : index
    %2 = vector.load %arg1[%c0_1, %c0_2, %c0_3] : memref<9x128x128xbf16, #tpu.memory_space<vmem>>, vector<1x128x128xbf16>
    %3 = vector.shape_cast %2 : vector<1x128x128xbf16> to vector<128x128xbf16>
    %cst = arith.constant dense<0.000000e+00> : vector<16x128xf32>
    %4 = tpu.matmul %1, %3, %cst {dimension_numbers = #tpu.dot_dimension_numbers<[1], [0], [0], [1], [0, 0, 1, 1], [], []>} : vector<16x128xbf16>, vector<128x128xbf16>, vector<16x128xf32> -> vector<16x128xf32>
    %cst_4 = arith.constant dense<0.000000e+00> : vector<128xf32>
    %5 = vector.multi_reduction <add>, %4, %cst_4 [0] : vector<16x128xf32> to vector<128xf32>
    %6 = vector.shape_cast %5 : vector<128xf32> to vector<1x128xf32>
    %cst_5 = arith.constant 1.600000e+01 : f32
    %7 = vector.broadcast %cst_5 : f32 to vector<1x128xf32>
    %8 = arith.divf %6, %7 : vector<1x128xf32>
    %9 = vector.broadcast %8 : vector<1x128xf32> to vector<16x128xf32>
    %10 = arith.subf %4, %9 : vector<16x128xf32>
    %11 = arith.mulf %10, %10 : vector<16x128xf32>
    %cst_6 = arith.constant dense<0.000000e+00> : vector<128xf32>
    %12 = vector.multi_reduction <add>, %11, %cst_6 [0] : vector<16x128xf32> to vector<128xf32>
    %13 = vector.shape_cast %12 : vector<128xf32> to vector<1x128xf32>
    %cst_7 = arith.constant 1.600000e+01 : f32
    %14 = vector.broadcast %cst_7 : f32 to vector<1x128xf32>
    %15 = arith.divf %13, %14 : vector<1x128xf32>
    %c0_8 = arith.constant 0 : index
    %c0_9 = arith.constant 0 : index
    %c0_10 = arith.constant 0 : index
    %16 = vector.load %arg2[%c0_8, %c0_9, %c0_10] : memref<9x1x128xf32, #tpu.memory_space<vmem>>, vector<1x1x128xf32>
    %17 = vector.shape_cast %16 : vector<1x1x128xf32> to vector<1x128xf32>
    %cst_11 = arith.constant 9.99999974E-6 : f32
    %18 = vector.broadcast %cst_11 : f32 to vector<1x128xf32>
    %19 = arith.addf %15, %18 : vector<1x128xf32>
    %20 = math.rsqrt %19 : vector<1x128xf32>
    %21 = arith.mulf %17, %20 : vector<1x128xf32>
    %22 = vector.broadcast %21 : vector<1x128xf32> to vector<16x128xf32>
    %23 = arith.mulf %10, %22 : vector<16x128xf32>
    %c0_12 = arith.constant 0 : index
    %c0_13 = arith.constant 0 : index
    %c0_14 = arith.constant 0 : index
    %24 = vector.load %arg3[%c0_12, %c0_13, %c0_14] : memref<9x1x128xf32, #tpu.memory_space<vmem>>, vector<1x1x128xf32>
    %25 = vector.shape_cast %24 : vector<1x1x128xf32> to vector<1x128xf32>
    %26 = vector.broadcast %25 : vector<1x128xf32> to vector<16x128xf32>
    %27 = arith.addf %23, %26 : vector<16x128xf32>
    %cst_15 = arith.constant 0.000000e+00 : f32
    %28 = vector.broadcast %cst_15 : f32 to vector<16x128xf32>
    %29 = arith.maximumf %27, %28 : vector<16x128xf32>
    %30 = arith.truncf %29 : vector<16x128xf32> to vector<16x128xbf16>
    %c1 = arith.constant 1 : index
    %c0_16 = arith.constant 0 : index
    %c0_17 = arith.constant 0 : index
    %31 = vector.load %arg1[%c1, %c0_16, %c0_17] : memref<9x128x128xbf16, #tpu.memory_space<vmem>>, vector<1x128x128xbf16>
    %32 = vector.shape_cast %31 : vector<1x128x128xbf16> to vector<128x128xbf16>
    %cst_18 = arith.constant dense<0.000000e+00> : vector<16x128xf32>
    %33 = tpu.matmul %30, %32, %cst_18 {dimension_numbers = #tpu.dot_dimension_numbers<[1], [0], [0], [1], [0, 0, 1, 1], [], []>} : vector<16x128xbf16>, vector<128x128xbf16>, vector<16x128xf32> -> vector<16x128xf32>
    %cst_19 = arith.constant dense<0.000000e+00> : vector<128xf32>
    %34 = vector.multi_reduction <add>, %33, %cst_19 [0] : vector<16x128xf32> to vector<128xf32>
    %35 = vector.shape_cast %34 : vector<128xf32> to vector<1x128xf32>
    %cst_20 = arith.constant 1.600000e+01 : f32
    %36 = vector.broadcast %cst_20 : f32 to vector<1x128xf32>
    %37 = arith.divf %35, %36 : vector<1x128xf32>
    %38 = vector.broadcast %37 : vector<1x128xf32> to vector<16x128xf32>
    %39 = arith.subf %33, %38 : vector<16x128xf32>
    %40 = arith.mulf %39, %39 : vector<16x128xf32>
    %cst_21 = arith.constant dense<0.000000e+00> : vector<128xf32>
    %41 = vector.multi_reduction <add>, %40, %cst_21 [0] : vector<16x128xf32> to vector<128xf32>
    %42 = vector.shape_cast %41 : vector<128xf32> to vector<1x128xf32>
    %cst_22 = arith.constant 1.600000e+01 : f32
    %43 = vector.broadcast %cst_22 : f32 to vector<1x128xf32>
    %44 = arith.divf %42, %43 : vector<1x128xf32>
    %c1_23 = arith.constant 1 : index
    %c0_24 = arith.constant 0 : index
    %c0_25 = arith.constant 0 : index
    %45 = vector.load %arg2[%c1_23, %c0_24, %c0_25] : memref<9x1x128xf32, #tpu.memory_space<vmem>>, vector<1x1x128xf32>
    %46 = vector.shape_cast %45 : vector<1x1x128xf32> to vector<1x128xf32>
    %cst_26 = arith.constant 9.99999974E-6 : f32
    %47 = vector.broadcast %cst_26 : f32 to vector<1x128xf32>
    %48 = arith.addf %44, %47 : vector<1x128xf32>
    %49 = math.rsqrt %48 : vector<1x128xf32>
    %50 = arith.mulf %46, %49 : vector<1x128xf32>
    %51 = vector.broadcast %50 : vector<1x128xf32> to vector<16x128xf32>
    %52 = arith.mulf %39, %51 : vector<16x128xf32>
    %c1_27 = arith.constant 1 : index
    %c0_28 = arith.constant 0 : index
    %c0_29 = arith.constant 0 : index
    %53 = vector.load %arg3[%c1_27, %c0_28, %c0_29] : memref<9x1x128xf32, #tpu.memory_space<vmem>>, vector<1x1x128xf32>
    %54 = vector.shape_cast %53 : vector<1x1x128xf32> to vector<1x128xf32>
    %55 = vector.broadcast %54 : vector<1x128xf32> to vector<16x128xf32>
    %56 = arith.addf %52, %55 : vector<16x128xf32>
    %cst_30 = arith.constant 0.000000e+00 : f32
    %57 = vector.broadcast %cst_30 : f32 to vector<16x128xf32>
    %58 = arith.maximumf %56, %57 : vector<16x128xf32>
    %59 = arith.truncf %58 : vector<16x128xf32> to vector<16x128xbf16>
    %c2 = arith.constant 2 : index
    %c0_31 = arith.constant 0 : index
    %c0_32 = arith.constant 0 : index
    %60 = vector.load %arg1[%c2, %c0_31, %c0_32] : memref<9x128x128xbf16, #tpu.memory_space<vmem>>, vector<1x128x128xbf16>
    %61 = vector.shape_cast %60 : vector<1x128x128xbf16> to vector<128x128xbf16>
    %cst_33 = arith.constant dense<0.000000e+00> : vector<16x128xf32>
    %62 = tpu.matmul %59, %61, %cst_33 {dimension_numbers = #tpu.dot_dimension_numbers<[1], [0], [0], [1], [0, 0, 1, 1], [], []>} : vector<16x128xbf16>, vector<128x128xbf16>, vector<16x128xf32> -> vector<16x128xf32>
    %cst_34 = arith.constant dense<0.000000e+00> : vector<128xf32>
    %63 = vector.multi_reduction <add>, %62, %cst_34 [0] : vector<16x128xf32> to vector<128xf32>
    %64 = vector.shape_cast %63 : vector<128xf32> to vector<1x128xf32>
    %cst_35 = arith.constant 1.600000e+01 : f32
    %65 = vector.broadcast %cst_35 : f32 to vector<1x128xf32>
    %66 = arith.divf %64, %65 : vector<1x128xf32>
    %67 = vector.broadcast %66 : vector<1x128xf32> to vector<16x128xf32>
    %68 = arith.subf %62, %67 : vector<16x128xf32>
    %69 = arith.mulf %68, %68 : vector<16x128xf32>
    %cst_36 = arith.constant dense<0.000000e+00> : vector<128xf32>
    %70 = vector.multi_reduction <add>, %69, %cst_36 [0] : vector<16x128xf32> to vector<128xf32>
    %71 = vector.shape_cast %70 : vector<128xf32> to vector<1x128xf32>
    %cst_37 = arith.constant 1.600000e+01 : f32
    %72 = vector.broadcast %cst_37 : f32 to vector<1x128xf32>
    %73 = arith.divf %71, %72 : vector<1x128xf32>
    %c2_38 = arith.constant 2 : index
    %c0_39 = arith.constant 0 : index
    %c0_40 = arith.constant 0 : index
    %74 = vector.load %arg2[%c2_38, %c0_39, %c0_40] : memref<9x1x128xf32, #tpu.memory_space<vmem>>, vector<1x1x128xf32>
    %75 = vector.shape_cast %74 : vector<1x1x128xf32> to vector<1x128xf32>
    %cst_41 = arith.constant 9.99999974E-6 : f32
    %76 = vector.broadcast %cst_41 : f32 to vector<1x128xf32>
    %77 = arith.addf %73, %76 : vector<1x128xf32>
    %78 = math.rsqrt %77 : vector<1x128xf32>
    %79 = arith.mulf %75, %78 : vector<1x128xf32>
    %80 = vector.broadcast %79 : vector<1x128xf32> to vector<16x128xf32>
    %81 = arith.mulf %68, %80 : vector<16x128xf32>
    %c2_42 = arith.constant 2 : index
    %c0_43 = arith.constant 0 : index
    %c0_44 = arith.constant 0 : index
    %82 = vector.load %arg3[%c2_42, %c0_43, %c0_44] : memref<9x1x128xf32, #tpu.memory_space<vmem>>, vector<1x1x128xf32>
    %83 = vector.shape_cast %82 : vector<1x1x128xf32> to vector<1x128xf32>
    %84 = vector.broadcast %83 : vector<1x128xf32> to vector<16x128xf32>
    %85 = arith.addf %81, %84 : vector<16x128xf32>
    %cst_45 = arith.constant 0.000000e+00 : f32
    %86 = vector.broadcast %cst_45 : f32 to vector<16x128xf32>
    %87 = arith.maximumf %85, %86 : vector<16x128xf32>
    %88 = arith.truncf %87 : vector<16x128xf32> to vector<16x128xbf16>
    %c3 = arith.constant 3 : index
    %c0_46 = arith.constant 0 : index
    %c0_47 = arith.constant 0 : index
    %89 = vector.load %arg1[%c3, %c0_46, %c0_47] : memref<9x128x128xbf16, #tpu.memory_space<vmem>>, vector<1x128x128xbf16>
    %90 = vector.shape_cast %89 : vector<1x128x128xbf16> to vector<128x128xbf16>
    %cst_48 = arith.constant dense<0.000000e+00> : vector<16x128xf32>
    %91 = tpu.matmul %88, %90, %cst_48 {dimension_numbers = #tpu.dot_dimension_numbers<[1], [0], [0], [1], [0, 0, 1, 1], [], []>} : vector<16x128xbf16>, vector<128x128xbf16>, vector<16x128xf32> -> vector<16x128xf32>
    %cst_49 = arith.constant dense<0.000000e+00> : vector<128xf32>
    %92 = vector.multi_reduction <add>, %91, %cst_49 [0] : vector<16x128xf32> to vector<128xf32>
    %93 = vector.shape_cast %92 : vector<128xf32> to vector<1x128xf32>
    %cst_50 = arith.constant 1.600000e+01 : f32
    %94 = vector.broadcast %cst_50 : f32 to vector<1x128xf32>
    %95 = arith.divf %93, %94 : vector<1x128xf32>
    %96 = vector.broadcast %95 : vector<1x128xf32> to vector<16x128xf32>
    %97 = arith.subf %91, %96 : vector<16x128xf32>
    %98 = arith.mulf %97, %97 : vector<16x128xf32>
    %cst_51 = arith.constant dense<0.000000e+00> : vector<128xf32>
    %99 = vector.multi_reduction <add>, %98, %cst_51 [0] : vector<16x128xf32> to vector<128xf32>
    %100 = vector.shape_cast %99 : vector<128xf32> to vector<1x128xf32>
    %cst_52 = arith.constant 1.600000e+01 : f32
    %101 = vector.broadcast %cst_52 : f32 to vector<1x128xf32>
    %102 = arith.divf %100, %101 : vector<1x128xf32>
    %c3_53 = arith.constant 3 : index
    %c0_54 = arith.constant 0 : index
    %c0_55 = arith.constant 0 : index
    %103 = vector.load %arg2[%c3_53, %c0_54, %c0_55] : memref<9x1x128xf32, #tpu.memory_space<vmem>>, vector<1x1x128xf32>
    %104 = vector.shape_cast %103 : vector<1x1x128xf32> to vector<1x128xf32>
    %cst_56 = arith.constant 9.99999974E-6 : f32
    %105 = vector.broadcast %cst_56 : f32 to vector<1x128xf32>
    %106 = arith.addf %102, %105 : vector<1x128xf32>
    %107 = math.rsqrt %106 : vector<1x128xf32>
    %108 = arith.mulf %104, %107 : vector<1x128xf32>
    %109 = vector.broadcast %108 : vector<1x128xf32> to vector<16x128xf32>
    %110 = arith.mulf %97, %109 : vector<16x128xf32>
    %c3_57 = arith.constant 3 : index
    %c0_58 = arith.constant 0 : index
    %c0_59 = arith.constant 0 : index
    %111 = vector.load %arg3[%c3_57, %c0_58, %c0_59] : memref<9x1x128xf32, #tpu.memory_space<vmem>>, vector<1x1x128xf32>
    %112 = vector.shape_cast %111 : vector<1x1x128xf32> to vector<1x128xf32>
    %113 = vector.broadcast %112 : vector<1x128xf32> to vector<16x128xf32>
    %114 = arith.addf %110, %113 : vector<16x128xf32>
    %cst_60 = arith.constant 0.000000e+00 : f32
    %115 = vector.broadcast %cst_60 : f32 to vector<16x128xf32>
    %116 = arith.maximumf %114, %115 : vector<16x128xf32>
    %117 = arith.truncf %116 : vector<16x128xf32> to vector<16x128xbf16>
    %c4 = arith.constant 4 : index
    %c0_61 = arith.constant 0 : index
    %c0_62 = arith.constant 0 : index
    %118 = vector.load %arg1[%c4, %c0_61, %c0_62] : memref<9x128x128xbf16, #tpu.memory_space<vmem>>, vector<1x128x128xbf16>
    %119 = vector.shape_cast %118 : vector<1x128x128xbf16> to vector<128x128xbf16>
    %cst_63 = arith.constant dense<0.000000e+00> : vector<16x128xf32>
    %120 = tpu.matmul %117, %119, %cst_63 {dimension_numbers = #tpu.dot_dimension_numbers<[1], [0], [0], [1], [0, 0, 1, 1], [], []>} : vector<16x128xbf16>, vector<128x128xbf16>, vector<16x128xf32> -> vector<16x128xf32>
    %cst_64 = arith.constant dense<0.000000e+00> : vector<128xf32>
    %121 = vector.multi_reduction <add>, %120, %cst_64 [0] : vector<16x128xf32> to vector<128xf32>
    %122 = vector.shape_cast %121 : vector<128xf32> to vector<1x128xf32>
    %cst_65 = arith.constant 1.600000e+01 : f32
    %123 = vector.broadcast %cst_65 : f32 to vector<1x128xf32>
    %124 = arith.divf %122, %123 : vector<1x128xf32>
    %125 = vector.broadcast %124 : vector<1x128xf32> to vector<16x128xf32>
    %126 = arith.subf %120, %125 : vector<16x128xf32>
    %127 = arith.mulf %126, %126 : vector<16x128xf32>
    %cst_66 = arith.constant dense<0.000000e+00> : vector<128xf32>
    %128 = vector.multi_reduction <add>, %127, %cst_66 [0] : vector<16x128xf32> to vector<128xf32>
    %129 = vector.shape_cast %128 : vector<128xf32> to vector<1x128xf32>
    %cst_67 = arith.constant 1.600000e+01 : f32
    %130 = vector.broadcast %cst_67 : f32 to vector<1x128xf32>
    %131 = arith.divf %129, %130 : vector<1x128xf32>
    %c4_68 = arith.constant 4 : index
    %c0_69 = arith.constant 0 : index
    %c0_70 = arith.constant 0 : index
    %132 = vector.load %arg2[%c4_68, %c0_69, %c0_70] : memref<9x1x128xf32, #tpu.memory_space<vmem>>, vector<1x1x128xf32>
    %133 = vector.shape_cast %132 : vector<1x1x128xf32> to vector<1x128xf32>
    %cst_71 = arith.constant 9.99999974E-6 : f32
    %134 = vector.broadcast %cst_71 : f32 to vector<1x128xf32>
    %135 = arith.addf %131, %134 : vector<1x128xf32>
    %136 = math.rsqrt %135 : vector<1x128xf32>
    %137 = arith.mulf %133, %136 : vector<1x128xf32>
    %138 = vector.broadcast %137 : vector<1x128xf32> to vector<16x128xf32>
    %139 = arith.mulf %126, %138 : vector<16x128xf32>
    %c4_72 = arith.constant 4 : index
    %c0_73 = arith.constant 0 : index
    %c0_74 = arith.constant 0 : index
    %140 = vector.load %arg3[%c4_72, %c0_73, %c0_74] : memref<9x1x128xf32, #tpu.memory_space<vmem>>, vector<1x1x128xf32>
    %141 = vector.shape_cast %140 : vector<1x1x128xf32> to vector<1x128xf32>
    %142 = vector.broadcast %141 : vector<1x128xf32> to vector<16x128xf32>
    %143 = arith.addf %139, %142 : vector<16x128xf32>
    %cst_75 = arith.constant 0.000000e+00 : f32
    %144 = vector.broadcast %cst_75 : f32 to vector<16x128xf32>
    %145 = arith.maximumf %143, %144 : vector<16x128xf32>
    %146 = arith.truncf %145 : vector<16x128xf32> to vector<16x128xbf16>
    %c5 = arith.constant 5 : index
    %c0_76 = arith.constant 0 : index
    %c0_77 = arith.constant 0 : index
    %147 = vector.load %arg1[%c5, %c0_76, %c0_77] : memref<9x128x128xbf16, #tpu.memory_space<vmem>>, vector<1x128x128xbf16>
    %148 = vector.shape_cast %147 : vector<1x128x128xbf16> to vector<128x128xbf16>
    %cst_78 = arith.constant dense<0.000000e+00> : vector<16x128xf32>
    %149 = tpu.matmul %146, %148, %cst_78 {dimension_numbers = #tpu.dot_dimension_numbers<[1], [0], [0], [1], [0, 0, 1, 1], [], []>} : vector<16x128xbf16>, vector<128x128xbf16>, vector<16x128xf32> -> vector<16x128xf32>
    %cst_79 = arith.constant dense<0.000000e+00> : vector<128xf32>
    %150 = vector.multi_reduction <add>, %149, %cst_79 [0] : vector<16x128xf32> to vector<128xf32>
    %151 = vector.shape_cast %150 : vector<128xf32> to vector<1x128xf32>
    %cst_80 = arith.constant 1.600000e+01 : f32
    %152 = vector.broadcast %cst_80 : f32 to vector<1x128xf32>
    %153 = arith.divf %151, %152 : vector<1x128xf32>
    %154 = vector.broadcast %153 : vector<1x128xf32> to vector<16x128xf32>
    %155 = arith.subf %149, %154 : vector<16x128xf32>
    %156 = arith.mulf %155, %155 : vector<16x128xf32>
    %cst_81 = arith.constant dense<0.000000e+00> : vector<128xf32>
    %157 = vector.multi_reduction <add>, %156, %cst_81 [0] : vector<16x128xf32> to vector<128xf32>
    %158 = vector.shape_cast %157 : vector<128xf32> to vector<1x128xf32>
    %cst_82 = arith.constant 1.600000e+01 : f32
    %159 = vector.broadcast %cst_82 : f32 to vector<1x128xf32>
    %160 = arith.divf %158, %159 : vector<1x128xf32>
    %c5_83 = arith.constant 5 : index
    %c0_84 = arith.constant 0 : index
    %c0_85 = arith.constant 0 : index
    %161 = vector.load %arg2[%c5_83, %c0_84, %c0_85] : memref<9x1x128xf32, #tpu.memory_space<vmem>>, vector<1x1x128xf32>
    %162 = vector.shape_cast %161 : vector<1x1x128xf32> to vector<1x128xf32>
    %cst_86 = arith.constant 9.99999974E-6 : f32
    %163 = vector.broadcast %cst_86 : f32 to vector<1x128xf32>
    %164 = arith.addf %160, %163 : vector<1x128xf32>
    %165 = math.rsqrt %164 : vector<1x128xf32>
    %166 = arith.mulf %162, %165 : vector<1x128xf32>
    %167 = vector.broadcast %166 : vector<1x128xf32> to vector<16x128xf32>
    %168 = arith.mulf %155, %167 : vector<16x128xf32>
    %c5_87 = arith.constant 5 : index
    %c0_88 = arith.constant 0 : index
    %c0_89 = arith.constant 0 : index
    %169 = vector.load %arg3[%c5_87, %c0_88, %c0_89] : memref<9x1x128xf32, #tpu.memory_space<vmem>>, vector<1x1x128xf32>
    %170 = vector.shape_cast %169 : vector<1x1x128xf32> to vector<1x128xf32>
    %171 = vector.broadcast %170 : vector<1x128xf32> to vector<16x128xf32>
    %172 = arith.addf %168, %171 : vector<16x128xf32>
    %cst_90 = arith.constant 0.000000e+00 : f32
    %173 = vector.broadcast %cst_90 : f32 to vector<16x128xf32>
    %174 = arith.maximumf %172, %173 : vector<16x128xf32>
    %175 = arith.truncf %174 : vector<16x128xf32> to vector<16x128xbf16>
    %c6 = arith.constant 6 : index
    %c0_91 = arith.constant 0 : index
    %c0_92 = arith.constant 0 : index
    %176 = vector.load %arg1[%c6, %c0_91, %c0_92] : memref<9x128x128xbf16, #tpu.memory_space<vmem>>, vector<1x128x128xbf16>
    %177 = vector.shape_cast %176 : vector<1x128x128xbf16> to vector<128x128xbf16>
    %cst_93 = arith.constant dense<0.000000e+00> : vector<16x128xf32>
    %178 = tpu.matmul %175, %177, %cst_93 {dimension_numbers = #tpu.dot_dimension_numbers<[1], [0], [0], [1], [0, 0, 1, 1], [], []>} : vector<16x128xbf16>, vector<128x128xbf16>, vector<16x128xf32> -> vector<16x128xf32>
    %cst_94 = arith.constant dense<0.000000e+00> : vector<128xf32>
    %179 = vector.multi_reduction <add>, %178, %cst_94 [0] : vector<16x128xf32> to vector<128xf32>
    %180 = vector.shape_cast %179 : vector<128xf32> to vector<1x128xf32>
    %cst_95 = arith.constant 1.600000e+01 : f32
    %181 = vector.broadcast %cst_95 : f32 to vector<1x128xf32>
    %182 = arith.divf %180, %181 : vector<1x128xf32>
    %183 = vector.broadcast %182 : vector<1x128xf32> to vector<16x128xf32>
    %184 = arith.subf %178, %183 : vector<16x128xf32>
    %185 = arith.mulf %184, %184 : vector<16x128xf32>
    %cst_96 = arith.constant dense<0.000000e+00> : vector<128xf32>
    %186 = vector.multi_reduction <add>, %185, %cst_96 [0] : vector<16x128xf32> to vector<128xf32>
    %187 = vector.shape_cast %186 : vector<128xf32> to vector<1x128xf32>
    %cst_97 = arith.constant 1.600000e+01 : f32
    %188 = vector.broadcast %cst_97 : f32 to vector<1x128xf32>
    %189 = arith.divf %187, %188 : vector<1x128xf32>
    %c6_98 = arith.constant 6 : index
    %c0_99 = arith.constant 0 : index
    %c0_100 = arith.constant 0 : index
    %190 = vector.load %arg2[%c6_98, %c0_99, %c0_100] : memref<9x1x128xf32, #tpu.memory_space<vmem>>, vector<1x1x128xf32>
    %191 = vector.shape_cast %190 : vector<1x1x128xf32> to vector<1x128xf32>
    %cst_101 = arith.constant 9.99999974E-6 : f32
    %192 = vector.broadcast %cst_101 : f32 to vector<1x128xf32>
    %193 = arith.addf %189, %192 : vector<1x128xf32>
    %194 = math.rsqrt %193 : vector<1x128xf32>
    %195 = arith.mulf %191, %194 : vector<1x128xf32>
    %196 = vector.broadcast %195 : vector<1x128xf32> to vector<16x128xf32>
    %197 = arith.mulf %184, %196 : vector<16x128xf32>
    %c6_102 = arith.constant 6 : index
    %c0_103 = arith.constant 0 : index
    %c0_104 = arith.constant 0 : index
    %198 = vector.load %arg3[%c6_102, %c0_103, %c0_104] : memref<9x1x128xf32, #tpu.memory_space<vmem>>, vector<1x1x128xf32>
    %199 = vector.shape_cast %198 : vector<1x1x128xf32> to vector<1x128xf32>
    %200 = vector.broadcast %199 : vector<1x128xf32> to vector<16x128xf32>
    %201 = arith.addf %197, %200 : vector<16x128xf32>
    %cst_105 = arith.constant 0.000000e+00 : f32
    %202 = vector.broadcast %cst_105 : f32 to vector<16x128xf32>
    %203 = arith.maximumf %201, %202 : vector<16x128xf32>
    %204 = arith.truncf %203 : vector<16x128xf32> to vector<16x128xbf16>
    %c7 = arith.constant 7 : index
    %c0_106 = arith.constant 0 : index
    %c0_107 = arith.constant 0 : index
    %205 = vector.load %arg1[%c7, %c0_106, %c0_107] : memref<9x128x128xbf16, #tpu.memory_space<vmem>>, vector<1x128x128xbf16>
    %206 = vector.shape_cast %205 : vector<1x128x128xbf16> to vector<128x128xbf16>
    %cst_108 = arith.constant dense<0.000000e+00> : vector<16x128xf32>
    %207 = tpu.matmul %204, %206, %cst_108 {dimension_numbers = #tpu.dot_dimension_numbers<[1], [0], [0], [1], [0, 0, 1, 1], [], []>} : vector<16x128xbf16>, vector<128x128xbf16>, vector<16x128xf32> -> vector<16x128xf32>
    %cst_109 = arith.constant dense<0.000000e+00> : vector<128xf32>
    %208 = vector.multi_reduction <add>, %207, %cst_109 [0] : vector<16x128xf32> to vector<128xf32>
    %209 = vector.shape_cast %208 : vector<128xf32> to vector<1x128xf32>
    %cst_110 = arith.constant 1.600000e+01 : f32
    %210 = vector.broadcast %cst_110 : f32 to vector<1x128xf32>
    %211 = arith.divf %209, %210 : vector<1x128xf32>
    %212 = vector.broadcast %211 : vector<1x128xf32> to vector<16x128xf32>
    %213 = arith.subf %207, %212 : vector<16x128xf32>
    %214 = arith.mulf %213, %213 : vector<16x128xf32>
    %cst_111 = arith.constant dense<0.000000e+00> : vector<128xf32>
    %215 = vector.multi_reduction <add>, %214, %cst_111 [0] : vector<16x128xf32> to vector<128xf32>
    %216 = vector.shape_cast %215 : vector<128xf32> to vector<1x128xf32>
    %cst_112 = arith.constant 1.600000e+01 : f32
    %217 = vector.broadcast %cst_112 : f32 to vector<1x128xf32>
    %218 = arith.divf %216, %217 : vector<1x128xf32>
    %c7_113 = arith.constant 7 : index
    %c0_114 = arith.constant 0 : index
    %c0_115 = arith.constant 0 : index
    %219 = vector.load %arg2[%c7_113, %c0_114, %c0_115] : memref<9x1x128xf32, #tpu.memory_space<vmem>>, vector<1x1x128xf32>
    %220 = vector.shape_cast %219 : vector<1x1x128xf32> to vector<1x128xf32>
    %cst_116 = arith.constant 9.99999974E-6 : f32
    %221 = vector.broadcast %cst_116 : f32 to vector<1x128xf32>
    %222 = arith.addf %218, %221 : vector<1x128xf32>
    %223 = math.rsqrt %222 : vector<1x128xf32>
    %224 = arith.mulf %220, %223 : vector<1x128xf32>
    %225 = vector.broadcast %224 : vector<1x128xf32> to vector<16x128xf32>
    %226 = arith.mulf %213, %225 : vector<16x128xf32>
    %c7_117 = arith.constant 7 : index
    %c0_118 = arith.constant 0 : index
    %c0_119 = arith.constant 0 : index
    %227 = vector.load %arg3[%c7_117, %c0_118, %c0_119] : memref<9x1x128xf32, #tpu.memory_space<vmem>>, vector<1x1x128xf32>
    %228 = vector.shape_cast %227 : vector<1x1x128xf32> to vector<1x128xf32>
    %229 = vector.broadcast %228 : vector<1x128xf32> to vector<16x128xf32>
    %230 = arith.addf %226, %229 : vector<16x128xf32>
    %cst_120 = arith.constant 0.000000e+00 : f32
    %231 = vector.broadcast %cst_120 : f32 to vector<16x128xf32>
    %232 = arith.maximumf %230, %231 : vector<16x128xf32>
    %233 = arith.truncf %232 : vector<16x128xf32> to vector<16x128xbf16>
    %c8 = arith.constant 8 : index
    %c0_121 = arith.constant 0 : index
    %c0_122 = arith.constant 0 : index
    %234 = vector.load %arg1[%c8, %c0_121, %c0_122] : memref<9x128x128xbf16, #tpu.memory_space<vmem>>, vector<1x128x128xbf16>
    %235 = vector.shape_cast %234 : vector<1x128x128xbf16> to vector<128x128xbf16>
    %cst_123 = arith.constant dense<0.000000e+00> : vector<16x128xf32>
    %236 = tpu.matmul %233, %235, %cst_123 {dimension_numbers = #tpu.dot_dimension_numbers<[1], [0], [0], [1], [0, 0, 1, 1], [], []>} : vector<16x128xbf16>, vector<128x128xbf16>, vector<16x128xf32> -> vector<16x128xf32>
    %cst_124 = arith.constant dense<0.000000e+00> : vector<128xf32>
    %237 = vector.multi_reduction <add>, %236, %cst_124 [0] : vector<16x128xf32> to vector<128xf32>
    %238 = vector.shape_cast %237 : vector<128xf32> to vector<1x128xf32>
    %cst_125 = arith.constant 1.600000e+01 : f32
    %239 = vector.broadcast %cst_125 : f32 to vector<1x128xf32>
    %240 = arith.divf %238, %239 : vector<1x128xf32>
    %241 = vector.broadcast %240 : vector<1x128xf32> to vector<16x128xf32>
    %242 = arith.subf %236, %241 : vector<16x128xf32>
    %243 = arith.mulf %242, %242 : vector<16x128xf32>
    %cst_126 = arith.constant dense<0.000000e+00> : vector<128xf32>
    %244 = vector.multi_reduction <add>, %243, %cst_126 [0] : vector<16x128xf32> to vector<128xf32>
    %245 = vector.shape_cast %244 : vector<128xf32> to vector<1x128xf32>
    %cst_127 = arith.constant 1.600000e+01 : f32
    %246 = vector.broadcast %cst_127 : f32 to vector<1x128xf32>
    %247 = arith.divf %245, %246 : vector<1x128xf32>
    %c8_128 = arith.constant 8 : index
    %c0_129 = arith.constant 0 : index
    %c0_130 = arith.constant 0 : index
    %248 = vector.load %arg2[%c8_128, %c0_129, %c0_130] : memref<9x1x128xf32, #tpu.memory_space<vmem>>, vector<1x1x128xf32>
    %249 = vector.shape_cast %248 : vector<1x1x128xf32> to vector<1x128xf32>
    %cst_131 = arith.constant 9.99999974E-6 : f32
    %250 = vector.broadcast %cst_131 : f32 to vector<1x128xf32>
    %251 = arith.addf %247, %250 : vector<1x128xf32>
    %252 = math.rsqrt %251 : vector<1x128xf32>
    %253 = arith.mulf %249, %252 : vector<1x128xf32>
    %254 = vector.broadcast %253 : vector<1x128xf32> to vector<16x128xf32>
    %255 = arith.mulf %242, %254 : vector<16x128xf32>
    %c8_132 = arith.constant 8 : index
    %c0_133 = arith.constant 0 : index
    %c0_134 = arith.constant 0 : index
    %256 = vector.load %arg3[%c8_132, %c0_133, %c0_134] : memref<9x1x128xf32, #tpu.memory_space<vmem>>, vector<1x1x128xf32>
    %257 = vector.shape_cast %256 : vector<1x1x128xf32> to vector<1x128xf32>
    %258 = vector.broadcast %257 : vector<1x128xf32> to vector<16x128xf32>
    %259 = arith.addf %255, %258 : vector<16x128xf32>
    %cst_135 = arith.constant 0.000000e+00 : f32
    %260 = vector.broadcast %cst_135 : f32 to vector<16x128xf32>
    %261 = arith.maximumf %259, %260 : vector<16x128xf32>
    %262 = arith.truncf %261 : vector<16x128xf32> to vector<16x128xbf16>
    %c0_136 = arith.constant 0 : index
    %c0_137 = arith.constant 0 : index
    %263 = vector.load %arg4[%c0_136, %c0_137] : memref<128x128xbf16, #tpu.memory_space<vmem>>, vector<128x128xbf16>
    %cst_138 = arith.constant dense<0.000000e+00> : vector<16x128xf32>
    %264 = tpu.matmul %262, %263, %cst_138 {dimension_numbers = #tpu.dot_dimension_numbers<[1], [0], [0], [1], [0, 0, 1, 1], [], []>} : vector<16x128xbf16>, vector<128x128xbf16>, vector<16x128xf32> -> vector<16x128xf32>
    %c0_139 = arith.constant 0 : index
    %c0_140 = arith.constant 0 : index
    %265 = vector.load %arg5[%c0_139, %c0_140] : memref<1x128xf32, #tpu.memory_space<vmem>>, vector<1x128xf32>
    %266 = vector.broadcast %265 : vector<1x128xf32> to vector<16x128xf32>
    %267 = arith.addf %264, %266 : vector<16x128xf32>
    %c0_141 = arith.constant 0 : index
    %c0_142 = arith.constant 0 : index
    %268 = vector.load %arg6[%c0_141, %c0_142] : memref<16x128xf32, #tpu.memory_space<vmem>>, vector<16x128xf32>
    tpu.vector_store %arg6[%c0_141, %c0_142], %267 {strides = array<i32>} : memref<16x128xf32, #tpu.memory_space<vmem>>, vector<16x128xf32>,
    return
  }
}

</mosaic_0001>

<bundles_post_ra>
// kernel: table_mlp_forward.1
= control target key start
LH: loop header
LB: loop body
LE: loop exit
PB: predicated region body
PF: predicated region fallthrough
CT: control target
= control target key end

     0   :  { %11 = vsyncpa [#allocation3], 0  ;;  %s2354_s0 = inlined_call_operand.vmem [shape: f32[16,128], index: 0, kind: input, shape index: {}]   ;;  %s2355_s1 = inlined_call_operand.hbm [shape: bf16[9,128,128], index: 1, kind: input, shape index: {}]   ;;  %s2356_s2 = inlined_call_operand.vmem [shape: f32[9,1,128], index: 2, kind: input, shape index: {}]   ;;  %s2357_s3 = inlined_call_operand.vmem [shape: f32[9,1,128], index: 3, kind: input, shape index: {}]   ;;  %s2358_s4 = inlined_call_operand.vmem [shape: bf16[128,128], index: 4, kind: input, shape index: {}]   ;;  %s2359_s5 = inlined_call_operand.vmem [shape: f32[1,128], index: 5, kind: input, shape index: {}]   ;;  %s2360_s6 = inlined_call_operand.hbm [shape: f32[16,128], index: 6, kind: output, shape index: {}]  }
   0x1   :  { %12 = vsyncpa [#allocation4], 0  ;;  %s2089_s21 = smov [#allocation2]   ;;  %s2041_s25 = scalar_lea.hbm %s2355_s1, 9216 }
   0x2   :  { %s20_s22 = sshll.u32 %s2089_s21, 4  ;;  %p2042_p0 = scmp.ne.s32.totalorder %s2355_s1, %s2041_s25  ;;  %s21_s22 = int_to_ptr.vmem [resolvable:$true] %s20_s22 }
   0x3   :  { %p2045_p1 = scmp.lt.u32.totalorder %s2041_s25, %s2355_s1 }
   0x5   :  { %p2047_p2 = pnand %p2045_p1, %p2042_p0 }
   0x7   :  { %2050 = shalt.err (!%p2047_p2)
}
   0x8   :  { %s2051_s30 = scalar_lea.vmem %s21_s22, 9216  ;;  %p2056_p4 = scmp.lt.s32.totalorder %s21_s22, %s21_s22 }
   0x9   :  { %p2052_p3 = scmp.ne.s32.totalorder %s21_s22, %s2051_s30  ;;  %p2057_p5 = scmp.lt.s32.totalorder %s2051_s30, %s2051_s30 }
   0xb   :  { %p2058_p6 = por %p2057_p5, %p2056_p4 }
   0xd   :  { %p2059_p7 = pnand %p2058_p6, %p2052_p3 }
   0xf   :  { %2062 = shalt.err (!%p2059_p7)
}
  0x10   :  { %s2090_s7 = smov 64   ;;  %s2091_s8 = smov 4  }
  0x11   :  { %26 = dma.hbm_to_vmem [thread:$0]  %s2355_s1, 9216, %s21_s22, [#allocation3], %s2090_s7, %s2090_s7, %s2091_s8  }
  0x12   :  { %2085 = dma.done.wait [#allocation3], 9216  }
  0x13   :  { %2086 = vsyncadd [#allocation3], 4294958080  ;;  %v2092_v0 = vmov 0.0   ;;  %vm2093_vm0 = vmmov 0   ;;  %v1943_v1 = vld [vmem:[#allocation2] sm:$0xff]   ;;  %v1944_v2 = vld [vmem:[#allocation2 + $0x8] sm:$0xff]   ;;  %v173_v45 = vlaneseq }
  0x14   :  { %1735 = vmatprep.subr.bf16.mxu0 %v2092_v0  ;;  %1751 = vmatprep.mubr.msk.bf16.mxu0 %vm2093_vm0, %v2092_v0  ;;  %v1945_v3 = vld [vmem:[#allocation2 + $0x10] sm:$0xff]   ;;  %v1946_v4 = vld [vmem:[#allocation2 + $0x18] sm:$0xff]   ;;  %v1947_v5 = vld [vmem:[#allocation2 + $0x20] sm:$0xff]  }
  0x15   :  { %1755 = vmatprep.subr.bf16.mxu1 %v2092_v0  ;;  %1771 = vmatprep.mubr.msk.bf16.mxu1 %vm2093_vm0, %v2092_v0  ;;  %v1948_v6 = vld [vmem:[#allocation2 + $0x28] sm:$0xff]   ;;  %v1949_v7 = vld [vmem:[#allocation2 + $0x30] sm:$0xff]   ;;  %v1950_v8 = vld [vmem:[#allocation2 + $0x38] sm:$0xff]   ;;  %v174_v46 = vshrl.u32 %v173_v45, 7 }
  0x16   :  { %1736 = vmatpush3.bf16.msra.mxu0 %v1943_v1  ;;  %v39_v9 = vld [vmem:[%s2354_s0] sm:$0xff]  ;;  %v40_v10 = vld [vmem:[%s2354_s0 + $0x8] sm:$0xff]  ;;  %v1953_v14 = vld [vmem:[#allocation2 + $0x50] sm:$0xff]  }
  0x17   :  { %1737 = vmatprep.subr.bf16.mxu0 %v2092_v0  ;;  %v41_v11 = vpack.c.bf16 %v40_v10, %v39_v9  ;;  %v1951_v12 = vld [vmem:[#allocation2 + $0x40] sm:$0xff]   ;;  %v1952_v13 = vld [vmem:[#allocation2 + $0x48] sm:$0xff]   ;;  %v1954_v15 = vld [vmem:[#allocation2 + $0x58] sm:$0xff]   ;;  %v2177_v48 = vsub.s32 0, %v174_v46 }
  0x18   :  { %1756 = vmatpush3.bf16.msra.mxu1 %v1951_v12  ;;  %v1955_v16 = vld [vmem:[#allocation2 + $0x60] sm:$0xff]   ;;  %v1956_v17 = vld [vmem:[#allocation2 + $0x68] sm:$0xff]   ;;  %v1957_v18 = vld [vmem:[#allocation2 + $0x70] sm:$0xff]  }
  0x19   :  { %1757 = vmatprep.subr.bf16.mxu1 %v2092_v0  ;;  %v1958_v19 = vld [vmem:[#allocation2 + $0x78] sm:$0xff]   ;;  %v168_v47 = vld [vmem:[%s2356_s2] sm:$0x1]  ;;  %v1960_v61 = vld [vmem:[#allocation2 + $0x88] sm:$0xff]  }
  0x1a   :  { %1738 = vmatpush3.bf16.msra.mxu0 %v1944_v2  ;;  %v1547_v52 = vld [vmem:[%s2357_s3] ss:$0 sm:$0xff]  ;;  %v1961_v62 = vld [vmem:[#allocation2 + $0x90] sm:$0xff]   ;;  %v1962_v63 = vld [vmem:[#allocation2 + $0x98] sm:$0xff]  }
  0x1b   :  { %1739 = vmatprep.subr.bf16.mxu0 %v2092_v0  ;;  %v1959_v60 = vld [vmem:[#allocation2 + $0x80] sm:$0xff]   ;;  %v1964_v2 = vld [vmem:[#allocation2 + $0xa8] sm:$0xff]   ;;  %v1970_v45 = vld [vmem:[#allocation2 + $0xd8] sm:$0xff]  }
  0x1c   :  { %1758 = vmatpush3.bf16.msra.mxu1 %v1952_v13  ;;  %v1963_v1 = vld [vmem:[#allocation2 + $0xa0] sm:$0xff]  }
  0x1d   :  { %1759 = vmatprep.subr.bf16.mxu1 %v2092_v0  ;;  %v1971_v46 = vld [vmem:[#allocation2 + $0xe0] sm:$0xff]  }
  0x1e   :  { %1740 = vmatpush3.bf16.msra.mxu0 %v1945_v3  ;;  %v1965_v3 = vld [vmem:[#allocation2 + $0xb0] sm:$0xff]  }
  0x1f   :  { %1741 = vmatprep.subr.bf16.mxu0 %v2092_v0 }
  0x20   :  { %1760 = vmatpush3.bf16.msra.mxu1 %v1953_v14 }
  0x21   :  { %1761 = vmatprep.subr.bf16.mxu1 %v2092_v0 }
  0x22   :  { %1742 = vmatpush3.bf16.msra.mxu0 %v1946_v4  ;;  %v1966_v4 = vld [vmem:[#allocation2 + $0xb8] sm:$0xff]  }
  0x23   :  { %1743 = vmatprep.subr.bf16.mxu0 %v2092_v0 }
  0x24   :  { %1762 = vmatpush3.bf16.msra.mxu1 %v1954_v15 }
  0x25   :  { %1763 = vmatprep.subr.bf16.mxu1 %v2092_v0 }
  0x26   :  { %1744 = vmatpush3.bf16.msra.mxu0 %v1947_v5 }
  0x27   :  { %1745 = vmatprep.subr.bf16.mxu0 %v2092_v0 }
  0x28   :  { %1764 = vmatpush3.bf16.msra.mxu1 %v1955_v16 }
  0x29   :  { %1765 = vmatprep.subr.bf16.mxu1 %v2092_v0 }
  0x2a   :  { %1746 = vmatpush3.bf16.msra.mxu0 %v1948_v6 }
  0x2b   :  { %1747 = vmatprep.subr.bf16.mxu0 %v2092_v0 }
  0x2c   :  { %1766 = vmatpush3.bf16.msra.mxu1 %v1956_v17 }
  0x2d   :  { %1767 = vmatprep.subr.bf16.mxu1 %v2092_v0 }
  0x2e   :  { %1748 = vmatpush3.bf16.msra.mxu0 %v1949_v7 }
  0x2f   :  { %1749 = vmatprep.subr.bf16.mxu0 %v2092_v0 }
  0x30   :  { %1768 = vmatpush3.bf16.msra.mxu1 %v1957_v18 }
  0x31   :  { %1769 = vmatprep.subr.bf16.mxu1 %v2092_v0 }
  0x32   :  { %1750 = vmatpush3.bf16.msra.mxu0 %v1950_v8 }
  0x33   :  { %1775 = vmatprep.subr.bf16.mxu0 %v2092_v0 }
  0x34   :  { %1770 = vmatpush3.bf16.msra.mxu1 %v1958_v19 }
  0x35   :  { %1752 = vmatmul.mubr.bf16.vlgmr.msra.gmra.mrb[0].mxu0 %v41_v11  ;;  %1795 = vmatprep.subr.bf16.mxu1 %v2092_v0 }
  0x36   :  { %1791 = vmatprep.mubr.msk.bf16.mxu0 %vm2093_vm0, %v2092_v0  ;;  %1776 = vmatpush3.bf16.msra.mxu0 %v1959_v60 }
  0x37   :  { %1777 = vmatprep.subr.bf16.mxu0 %v2092_v0 }
  0x3a   :  { %1778 = vmatpush3.bf16.msra.mxu0 %v1960_v61 }
  0x3b   :  { %1779 = vmatprep.subr.bf16.mxu0 %v2092_v0 }
  0x3e   :  { %1780 = vmatpush3.bf16.msra.mxu0 %v1961_v62 }
  0x3f   :  { %1781 = vmatprep.subr.bf16.mxu0 %v2092_v0 }
  0x42   :  { %1782 = vmatpush3.bf16.msra.mxu0 %v1962_v63 }
  0x43   :  { %1783 = vmatprep.subr.bf16.mxu0 %v2092_v0 }
  0x46   :  { %1784 = vmatpush3.bf16.msra.mxu0 %v1963_v1 }
  0x47   :  { %1785 = vmatprep.subr.bf16.mxu0 %v2092_v0 }
  0x4a   :  { %1786 = vmatpush3.bf16.msra.mxu0 %v1964_v2 }
  0x4b   :  { %1787 = vmatprep.subr.bf16.mxu0 %v2092_v0 }
  0x4e   :  { %1788 = vmatpush3.bf16.msra.mxu0 %v1965_v3 }
  0x4f   :  { %1789 = vmatprep.subr.bf16.mxu0 %v2092_v0 }
  0x52   :  { %1790 = vmatpush3.bf16.msra.mxu0 %v1966_v4 }
  0x53   :  { %1815 = vmatprep.subr.bf16.mxu0 %v2092_v0 }
 0x108   :  { %v140_v20 = vpop.f32.mrb[0].mxu0 }
 0x109   :  { %v1753_v21 = vpop.f32.mrb[1].mxu0 }
 0x10a   :  { %v143_v22 = vpop.f32.mrb[2].mxu0 }
 0x10b   :  { %v147_v23 = vadd.f32 %v143_v22, %v140_v20  ;;  %v1754_v24 = vpop.f32.mrb[3].mxu0 }
 0x10d   :  { %v148_v25 = vrot.slane %v147_v23, 4 }
 0x10f   :  { %v149_v26 = vadd.f32 %v148_v25, %v147_v23 }
 0x111   :  { %v150_v27 = vrot.slane %v149_v26, 2 }
 0x113   :  { %v151_v28 = vadd.f32 %v150_v27, %v149_v26 }
 0x115   :  { %v152_v29 = vrot.slane %v151_v28, 1 }
 0x117   :  { %v153_v30 = vadd.f32 %v152_v29, %v151_v28 }
 0x119   :  { %v155_v31 = vmul.f32 0.0625, %v153_v30  ;;  %v1556_v30 = vld [vmem:[%s2356_s2 + $0x1] sm:$0x1] }
 0x11b   :  { %v156_v32 = vsub.f32 %v140_v20, %v155_v31  ;;  %v157_v33 = vsub.f32 %v143_v22, %v155_v31 }
 0x11d   :  { %v158_v34 = vmul.f32 %v156_v32, %v156_v32  ;;  %v159_v35 = vmul.f32 %v157_v33, %v157_v33 }
 0x11f   :  { %v160_v36 = vadd.f32 %v159_v35, %v158_v34  ;;  %v1558_v34 = vld [vmem:[%s2357_s3 + $0x1] ss:$0 sm:$0xff] }
 0x121   :  { %v161_v37 = vrot.slane %v160_v36, 4 }
 0x123   :  { %v162_v38 = vadd.f32 %v161_v37, %v160_v36 }
 0x125   :  { %v163_v39 = vrot.slane %v162_v38, 2 }
 0x127   :  { %v164_v40 = vadd.f32 %v163_v39, %v162_v38 }
 0x129   :  { %v165_v41 = vrot.slane %v164_v40, 1 }
 0x12b   :  { %v166_v42 = vadd.f32 %v165_v41, %v164_v40 }
 0x12d   :  { %v167_v43 = vmul.f32 0.0625, %v166_v42  ;;  %v1967_v42 = vld [vmem:[#allocation2 + $0xc0] sm:$0xff]  }
 0x12f   :  { %v169_v44 = vadd.f32 1e-05, %v167_v43  ;;  %v1968_v43 = vld [vmem:[#allocation2 + $0xc8] sm:$0xff]  }
 0x131   :  { %2023 = vrsqrt.f32 %v169_v44  ;;  %v1969_v44 = vld [vmem:[#allocation2 + $0xd0] sm:$0xff]  }
 0x13b   :  { %v2024_v49 = vpop.eup %2023 }
 0x13c   :  { %v171_v50 = vmul.f32 %v2024_v49, %v168_v47  ;;  %v1972_v47 = vld [vmem:[#allocation2 + $0xe8] sm:$0xff]   ;;  %v1973_v49 = vld [vmem:[#allocation2 + $0xf0] sm:$0xff]  }
 0x13e   :  { %v176_v51 = vrot.slane %v171_v50, %v2177_v48  ;;  %v1974_v50 = vld [vmem:[#allocation2 + $0xf8] sm:$0xff]  }
 0x140   :  { %v178_v53 = vmul.f32 %v176_v51, %v156_v32  ;;  %v179_v54 = vmul.f32 %v176_v51, %v157_v33 }
 0x142   :  { %v188_v55 = vadd.f32 %v1547_v52, %v179_v54  ;;  %v187_v56 = vadd.f32 %v1547_v52, %v178_v53 }
 0x144   :  { %v189_v57 = vmax.f32 %v187_v56, 0.0  ;;  %v190_v58 = vmax.f32 %v188_v55, 0.0 }
 0x146   :  { %v191_v59 = vpack.c.bf16 %v190_v58, %v189_v57 }
 0x148   :  { %1772 = vmatmul.mubr.bf16.vlgmr.msra.gmra.mrb[0].mxu1 %v191_v59 }
 0x149   :  { %1811 = vmatprep.mubr.msk.bf16.mxu1 %vm2093_vm0, %v2092_v0  ;;  %1796 = vmatpush3.bf16.msra.mxu1 %v1967_v42 }
 0x14a   :  { %1797 = vmatprep.subr.bf16.mxu1 %v2092_v0 }
 0x14d   :  { %1798 = vmatpush3.bf16.msra.mxu1 %v1968_v43 }
 0x14e   :  { %1799 = vmatprep.subr.bf16.mxu1 %v2092_v0 }
 0x151   :  { %1800 = vmatpush3.bf16.msra.mxu1 %v1969_v44 }
 0x152   :  { %1801 = vmatprep.subr.bf16.mxu1 %v2092_v0 }
 0x155   :  { %1802 = vmatpush3.bf16.msra.mxu1 %v1970_v45 }
 0x156   :  { %1803 = vmatprep.subr.bf16.mxu1 %v2092_v0 }
 0x159   :  { %1804 = vmatpush3.bf16.msra.mxu1 %v1971_v46 }
 0x15a   :  { %1805 = vmatprep.subr.bf16.mxu1 %v2092_v0 }
 0x15d   :  { %1806 = vmatpush3.bf16.msra.mxu1 %v1972_v47 }
 0x15e   :  { %1807 = vmatprep.subr.bf16.mxu1 %v2092_v0 }
 0x161   :  { %1808 = vmatpush3.bf16.msra.mxu1 %v1973_v49 }
 0x162   :  { %1809 = vmatprep.subr.bf16.mxu1 %v2092_v0 }
 0x165   :  { %1810 = vmatpush3.bf16.msra.mxu1 %v1974_v50 }
 0x166   :  { %1835 = vmatprep.subr.bf16.mxu1 %v2092_v0 }
 0x21b   :  { %v291_v5 = vpop.f32.mrb[0].mxu1 }
 0x21c   :  { %v1773_v6 = vpop.f32.mrb[1].mxu1 }
 0x21d   :  { %v294_v7 = vpop.f32.mrb[2].mxu1 }
 0x21e   :  { %v298_v8 = vadd.f32 %v294_v7, %v291_v5  ;;  %v1774_v9 = vpop.f32.mrb[3].mxu1 }
 0x220   :  { %v299_v10 = vrot.slane %v298_v8, 4 }
 0x222   :  { %v300_v11 = vadd.f32 %v299_v10, %v298_v8 }
 0x224   :  { %v301_v12 = vrot.slane %v300_v11, 2 }
 0x226   :  { %v302_v13 = vadd.f32 %v301_v12, %v300_v11 }
 0x228   :  { %v303_v14 = vrot.slane %v302_v13, 1 }
 0x22a   :  { %v304_v15 = vadd.f32 %v303_v14, %v302_v13  ;;  %v1567_v13 = vld [vmem:[%s2356_s2 + $0x2] sm:$0x1] }
 0x22c   :  { %v305_v16 = vmul.f32 0.0625, %v304_v15 }
 0x22e   :  { %v306_v17 = vsub.f32 %v291_v5, %v305_v16  ;;  %v307_v18 = vsub.f32 %v294_v7, %v305_v16 }
 0x230   :  { %v308_v19 = vmul.f32 %v306_v17, %v306_v17  ;;  %v309_v20 = vmul.f32 %v307_v18, %v307_v18 }
 0x232   :  { %v310_v21 = vadd.f32 %v309_v20, %v308_v19 }
 0x234   :  { %v311_v22 = vrot.slane %v310_v21, 4 }
 0x236   :  { %v312_v23 = vadd.f32 %v311_v22, %v310_v21 }
 0x238   :  { %v313_v24 = vrot.slane %v312_v23, 2 }
 0x23a   :  { %v314_v25 = vadd.f32 %v313_v24, %v312_v23 }
 0x23c   :  { %v315_v26 = vrot.slane %v314_v25, 1 }
 0x23e   :  { %v316_v27 = vadd.f32 %v315_v26, %v314_v25  ;;  %v1975_v25 = vld [vmem:[#allocation2 + $0x100] sm:$0xff]   ;;  %v1976_v26 = vld [vmem:[#allocation2 + $0x108] sm:$0xff]  }
 0x240   :  { %v317_v28 = vmul.f32 0.0625, %v316_v27  ;;  %v1977_v27 = vld [vmem:[#allocation2 + $0x110] sm:$0xff]  }
 0x242   :  { %v320_v29 = vadd.f32 1e-05, %v317_v28  ;;  %v1978_v28 = vld [vmem:[#allocation2 + $0x118] sm:$0xff]  }
 0x244   :  { %2025 = vrsqrt.f32 %v320_v29  ;;  %v1979_v29 = vld [vmem:[#allocation2 + $0x120] sm:$0xff]  }
 0x24e   :  { %v2026_v31 = vpop.eup %2025 }
 0x24f   :  { %v322_v32 = vmul.f32 %v2026_v31, %v1556_v30  ;;  %v1980_v30 = vld [vmem:[#allocation2 + $0x128] sm:$0xff]   ;;  %v1981_v31 = vld [vmem:[#allocation2 + $0x130] sm:$0xff]  }
 0x251   :  { %v327_v33 = vrot.slane %v322_v32, %v2177_v48  ;;  %v1982_v32 = vld [vmem:[#allocation2 + $0x138] sm:$0xff]  }
 0x253   :  { %v329_v35 = vmul.f32 %v327_v33, %v306_v17  ;;  %v330_v36 = vmul.f32 %v327_v33, %v307_v18  ;;  %v1569_v17 = vld [vmem:[%s2357_s3 + $0x2] ss:$0 sm:$0xff] }
 0x255   :  { %v339_v37 = vadd.f32 %v1558_v34, %v329_v35  ;;  %v340_v38 = vadd.f32 %v1558_v34, %v330_v36 }
 0x257   :  { %v341_v39 = vmax.f32 %v339_v37, 0.0  ;;  %v342_v40 = vmax.f32 %v340_v38, 0.0 }
 0x259   :  { %v343_v41 = vpack.c.bf16 %v342_v40, %v341_v39 }
 0x25b   :  { %1792 = vmatmul.mubr.bf16.vlgmr.msra.gmra.mrb[4].mxu0 %v343_v41 }
 0x25c   :  { %1831 = vmatprep.mubr.msk.bf16.mxu0 %vm2093_vm0, %v2092_v0  ;;  %1816 = vmatpush3.bf16.msra.mxu0 %v1975_v25 }
 0x25d   :  { %1817 = vmatprep.subr.bf16.mxu0 %v2092_v0 }
 0x260   :  { %1818 = vmatpush3.bf16.msra.mxu0 %v1976_v26 }
 0x261   :  { %1819 = vmatprep.subr.bf16.mxu0 %v2092_v0 }
 0x264   :  { %1820 = vmatpush3.bf16.msra.mxu0 %v1977_v27 }
 0x265   :  { %1821 = vmatprep.subr.bf16.mxu0 %v2092_v0 }
 0x268   :  { %1822 = vmatpush3.bf16.msra.mxu0 %v1978_v28 }
 0x269   :  { %1823 = vmatprep.subr.bf16.mxu0 %v2092_v0 }
 0x26c   :  { %1824 = vmatpush3.bf16.msra.mxu0 %v1979_v29 }
 0x26d   :  { %1825 = vmatprep.subr.bf16.mxu0 %v2092_v0 }
 0x270   :  { %1826 = vmatpush3.bf16.msra.mxu0 %v1980_v30 }
 0x271   :  { %1827 = vmatprep.subr.bf16.mxu0 %v2092_v0 }
 0x274   :  { %1828 = vmatpush3.bf16.msra.mxu0 %v1981_v31 }
 0x275   :  { %1829 = vmatprep.subr.bf16.mxu0 %v2092_v0 }
 0x278   :  { %1830 = vmatpush3.bf16.msra.mxu0 %v1982_v32 }
 0x279   :  { %1855 = vmatprep.subr.bf16.mxu0 %v2092_v0 }
 0x32e   :  { %v443_v51 = vpop.f32.mrb[4].mxu0 }
 0x32f   :  { %v1793_v52 = vpop.f32.mrb[5].mxu0 }
 0x330   :  { %v446_v53 = vpop.f32.mrb[6].mxu0 }
 0x331   :  { %v450_v54 = vadd.f32 %v446_v53, %v443_v51  ;;  %v1794_v55 = vpop.f32.mrb[7].mxu0 }
 0x333   :  { %v451_v56 = vrot.slane %v450_v54, 4 }
 0x335   :  { %v452_v57 = vadd.f32 %v451_v56, %v450_v54 }
 0x337   :  { %v453_v58 = vrot.slane %v452_v57, 2 }
 0x339   :  { %v454_v59 = vadd.f32 %v453_v58, %v452_v57 }
 0x33b   :  { %v455_v60 = vrot.slane %v454_v59, 1 }
 0x33d   :  { %v456_v61 = vadd.f32 %v455_v60, %v454_v59  ;;  %v1578_v59 = vld [vmem:[%s2356_s2 + $0x3] sm:$0x1] }
 0x33f   :  { %v457_v62 = vmul.f32 0.0625, %v456_v61 }
 0x341   :  { %v458_v63 = vsub.f32 %v443_v51, %v457_v62  ;;  %v459_v1 = vsub.f32 %v446_v53, %v457_v62 }
 0x343   :  { %v460_v2 = vmul.f32 %v458_v63, %v458_v63  ;;  %v461_v3 = vmul.f32 %v459_v1, %v459_v1 }
 0x345   :  { %v462_v4 = vadd.f32 %v461_v3, %v460_v2 }
 0x347   :  { %v463_v5 = vrot.slane %v462_v4, 4 }
 0x349   :  { %v464_v6 = vadd.f32 %v463_v5, %v462_v4 }
 0x34b   :  { %v465_v7 = vrot.slane %v464_v6, 2 }
 0x34d   :  { %v466_v8 = vadd.f32 %v465_v7, %v464_v6 }
 0x34f   :  { %v467_v9 = vrot.slane %v466_v8, 1 }
 0x351   :  { %v468_v10 = vadd.f32 %v467_v9, %v466_v8  ;;  %v1983_v8 = vld [vmem:[#allocation2 + $0x140] sm:$0xff]   ;;  %v1984_v9 = vld [vmem:[#allocation2 + $0x148] sm:$0xff]  }
 0x353   :  { %v469_v11 = vmul.f32 0.0625, %v468_v10  ;;  %v1985_v10 = vld [vmem:[#allocation2 + $0x150] sm:$0xff]  }
 0x355   :  { %v472_v12 = vadd.f32 1e-05, %v469_v11  ;;  %v1986_v11 = vld [vmem:[#allocation2 + $0x158] sm:$0xff]  }
 0x357   :  { %2027 = vrsqrt.f32 %v472_v12  ;;  %v1987_v12 = vld [vmem:[#allocation2 + $0x160] sm:$0xff]  }
 0x361   :  { %v2028_v14 = vpop.eup %2027 }
 0x362   :  { %v474_v15 = vmul.f32 %v2028_v14, %v1567_v13  ;;  %v1988_v13 = vld [vmem:[#allocation2 + $0x168] sm:$0xff]   ;;  %v1989_v14 = vld [vmem:[#allocation2 + $0x170] sm:$0xff]  }
 0x364   :  { %v479_v16 = vrot.slane %v474_v15, %v2177_v48  ;;  %v1990_v15 = vld [vmem:[#allocation2 + $0x178] sm:$0xff]  }
 0x366   :  { %v481_v18 = vmul.f32 %v479_v16, %v458_v63  ;;  %v482_v19 = vmul.f32 %v479_v16, %v459_v1  ;;  %v1580_v63 = vld [vmem:[%s2357_s3 + $0x3] ss:$0 sm:$0xff] }
 0x368   :  { %v491_v20 = vadd.f32 %v1569_v17, %v481_v18  ;;  %v492_v21 = vadd.f32 %v1569_v17, %v482_v19 }
 0x36a   :  { %v493_v22 = vmax.f32 %v491_v20, 0.0  ;;  %v494_v23 = vmax.f32 %v492_v21, 0.0 }
 0x36c   :  { %v495_v24 = vpack.c.bf16 %v494_v23, %v493_v22 }
 0x36e   :  { %1812 = vmatmul.mubr.bf16.vlgmr.msra.gmra.mrb[4].mxu1 %v495_v24 }
 0x36f   :  { %1851 = vmatprep.mubr.msk.bf16.mxu1 %vm2093_vm0, %v2092_v0  ;;  %1836 = vmatpush3.bf16.msra.mxu1 %v1983_v8 }
 0x370   :  { %1837 = vmatprep.subr.bf16.mxu1 %v2092_v0 }
 0x373   :  { %1838 = vmatpush3.bf16.msra.mxu1 %v1984_v9 }
 0x374   :  { %1839 = vmatprep.subr.bf16.mxu1 %v2092_v0 }
 0x377   :  { %1840 = vmatpush3.bf16.msra.mxu1 %v1985_v10 }
 0x378   :  { %1841 = vmatprep.subr.bf16.mxu1 %v2092_v0 }
 0x37b   :  { %1842 = vmatpush3.bf16.msra.mxu1 %v1986_v11 }
 0x37c   :  { %1843 = vmatprep.subr.bf16.mxu1 %v2092_v0 }
 0x37f   :  { %1844 = vmatpush3.bf16.msra.mxu1 %v1987_v12 }
 0x380   :  { %1845 = vmatprep.subr.bf16.mxu1 %v2092_v0 }
 0x383   :  { %1846 = vmatpush3.bf16.msra.mxu1 %v1988_v13 }
 0x384   :  { %1847 = vmatprep.subr.bf16.mxu1 %v2092_v0 }
 0x387   :  { %1848 = vmatpush3.bf16.msra.mxu1 %v1989_v14 }
 0x388   :  { %1849 = vmatprep.subr.bf16.mxu1 %v2092_v0 }
 0x38b   :  { %1850 = vmatpush3.bf16.msra.mxu1 %v1990_v15 }
 0x38c   :  { %1875 = vmatprep.subr.bf16.mxu1 %v2092_v0 }
 0x441   :  { %v595_v33 = vpop.f32.mrb[4].mxu1 }
 0x442   :  { %v1813_v34 = vpop.f32.mrb[5].mxu1 }
 0x443   :  { %v598_v35 = vpop.f32.mrb[6].mxu1 }
 0x444   :  { %v602_v36 = vadd.f32 %v598_v35, %v595_v33  ;;  %v1814_v37 = vpop.f32.mrb[7].mxu1 }
 0x446   :  { %v603_v38 = vrot.slane %v602_v36, 4 }
 0x448   :  { %v604_v39 = vadd.f32 %v603_v38, %v602_v36 }
 0x44a   :  { %v605_v40 = vrot.slane %v604_v39, 2 }
 0x44c   :  { %v606_v41 = vadd.f32 %v605_v40, %v604_v39 }
 0x44e   :  { %v607_v42 = vrot.slane %v606_v41, 1 }
 0x450   :  { %v608_v43 = vadd.f32 %v607_v42, %v606_v41  ;;  %v1589_v41 = vld [vmem:[%s2356_s2 + $0x4] sm:$0x1] }
 0x452   :  { %v609_v44 = vmul.f32 0.0625, %v608_v43 }
 0x454   :  { %v610_v45 = vsub.f32 %v595_v33, %v609_v44  ;;  %v611_v46 = vsub.f32 %v598_v35, %v609_v44 }
 0x456   :  { %v612_v47 = vmul.f32 %v610_v45, %v610_v45  ;;  %v613_v49 = vmul.f32 %v611_v46, %v611_v46 }
 0x458   :  { %v614_v50 = vadd.f32 %v613_v49, %v612_v47 }
 0x45a   :  { %v615_v51 = vrot.slane %v614_v50, 4 }
 0x45c   :  { %v616_v52 = vadd.f32 %v615_v51, %v614_v50 }
 0x45e   :  { %v617_v53 = vrot.slane %v616_v52, 2 }
 0x460   :  { %v618_v54 = vadd.f32 %v617_v53, %v616_v52 }
 0x462   :  { %v619_v55 = vrot.slane %v618_v54, 1 }
 0x464   :  { %v620_v56 = vadd.f32 %v619_v55, %v618_v54  ;;  %v1991_v54 = vld [vmem:[#allocation2 + $0x180] sm:$0xff]   ;;  %v1992_v55 = vld [vmem:[#allocation2 + $0x188] sm:$0xff]  }
 0x466   :  { %v621_v57 = vmul.f32 0.0625, %v620_v56  ;;  %v1993_v56 = vld [vmem:[#allocation2 + $0x190] sm:$0xff]  }
 0x468   :  { %v624_v58 = vadd.f32 1e-05, %v621_v57  ;;  %v1994_v57 = vld [vmem:[#allocation2 + $0x198] sm:$0xff]  }
 0x46a   :  { %2029 = vrsqrt.f32 %v624_v58  ;;  %v1995_v58 = vld [vmem:[#allocation2 + $0x1a0] sm:$0xff]  }
 0x474   :  { %v2030_v60 = vpop.eup %2029 }
 0x475   :  { %v626_v61 = vmul.f32 %v2030_v60, %v1578_v59  ;;  %v1996_v59 = vld [vmem:[#allocation2 + $0x1a8] sm:$0xff]   ;;  %v1997_v60 = vld [vmem:[#allocation2 + $0x1b0] sm:$0xff]  }
 0x477   :  { %v631_v62 = vrot.slane %v626_v61, %v2177_v48  ;;  %v1998_v61 = vld [vmem:[#allocation2 + $0x1b8] sm:$0xff]  }
 0x479   :  { %v633_v1 = vmul.f32 %v631_v62, %v610_v45  ;;  %v634_v2 = vmul.f32 %v631_v62, %v611_v46  ;;  %v1591_v45 = vld [vmem:[%s2357_s3 + $0x4] ss:$0 sm:$0xff] }
 0x47b   :  { %v643_v3 = vadd.f32 %v1580_v63, %v633_v1  ;;  %v644_v4 = vadd.f32 %v1580_v63, %v634_v2 }
 0x47d   :  { %v645_v5 = vmax.f32 %v643_v3, 0.0  ;;  %v646_v6 = vmax.f32 %v644_v4, 0.0 }
 0x47f   :  { %v647_v7 = vpack.c.bf16 %v646_v6, %v645_v5 }
 0x481   :  { %1832 = vmatmul.mubr.bf16.vlgmr.msra.gmra.mrb[8].mxu0 %v647_v7 }
 0x482   :  { %1871 = vmatprep.mubr.msk.bf16.mxu0 %vm2093_vm0, %v2092_v0  ;;  %1856 = vmatpush3.bf16.msra.mxu0 %v1991_v54 }
 0x483   :  { %1857 = vmatprep.subr.bf16.mxu0 %v2092_v0 }
 0x486   :  { %1858 = vmatpush3.bf16.msra.mxu0 %v1992_v55 }
 0x487   :  { %1859 = vmatprep.subr.bf16.mxu0 %v2092_v0 }
 0x48a   :  { %1860 = vmatpush3.bf16.msra.mxu0 %v1993_v56 }
 0x48b   :  { %1861 = vmatprep.subr.bf16.mxu0 %v2092_v0 }
 0x48e   :  { %1862 = vmatpush3.bf16.msra.mxu0 %v1994_v57 }
 0x48f   :  { %1863 = vmatprep.subr.bf16.mxu0 %v2092_v0 }
 0x492   :  { %1864 = vmatpush3.bf16.msra.mxu0 %v1995_v58 }
 0x493   :  { %1865 = vmatprep.subr.bf16.mxu0 %v2092_v0 }
 0x496   :  { %1866 = vmatpush3.bf16.msra.mxu0 %v1996_v59 }
 0x497   :  { %1867 = vmatprep.subr.bf16.mxu0 %v2092_v0 }
 0x49a   :  { %1868 = vmatpush3.bf16.msra.mxu0 %v1997_v60 }
 0x49b   :  { %1869 = vmatprep.subr.bf16.mxu0 %v2092_v0 }
 0x49e   :  { %1870 = vmatpush3.bf16.msra.mxu0 %v1998_v61 }
 0x49f   :  { %1895 = vmatprep.subr.bf16.mxu0 %v2092_v0 }
 0x554   :  { %v747_v16 = vpop.f32.mrb[8].mxu0 }
 0x555   :  { %v1833_v17 = vpop.f32.mrb[9].mxu0 }
 0x556   :  { %v750_v18 = vpop.f32.mrb[10].mxu0 }
 0x557   :  { %v754_v19 = vadd.f32 %v750_v18, %v747_v16  ;;  %v1834_v20 = vpop.f32.mrb[11].mxu0 }
 0x559   :  { %v755_v21 = vrot.slane %v754_v19, 4 }
 0x55b   :  { %v756_v22 = vadd.f32 %v755_v21, %v754_v19 }
 0x55d   :  { %v757_v23 = vrot.slane %v756_v22, 2 }
 0x55f   :  { %v758_v24 = vadd.f32 %v757_v23, %v756_v22 }
 0x561   :  { %v759_v25 = vrot.slane %v758_v24, 1 }
 0x563   :  { %v760_v26 = vadd.f32 %v759_v25, %v758_v24  ;;  %v1600_v24 = vld [vmem:[%s2356_s2 + $0x5] sm:$0x1] }
 0x565   :  { %v761_v27 = vmul.f32 0.0625, %v760_v26 }
 0x567   :  { %v762_v28 = vsub.f32 %v747_v16, %v761_v27  ;;  %v763_v29 = vsub.f32 %v750_v18, %v761_v27 }
 0x569   :  { %v764_v30 = vmul.f32 %v762_v28, %v762_v28  ;;  %v765_v31 = vmul.f32 %v763_v29, %v763_v29 }
 0x56b   :  { %v766_v32 = vadd.f32 %v765_v31, %v764_v30 }
 0x56d   :  { %v767_v33 = vrot.slane %v766_v32, 4 }
 0x56f   :  { %v768_v34 = vadd.f32 %v767_v33, %v766_v32 }
 0x571   :  { %v769_v35 = vrot.slane %v768_v34, 2 }
 0x573   :  { %v770_v36 = vadd.f32 %v769_v35, %v768_v34 }
 0x575   :  { %v771_v37 = vrot.slane %v770_v36, 1 }
 0x577   :  { %v772_v38 = vadd.f32 %v771_v37, %v770_v36  ;;  %v1999_v36 = vld [vmem:[#allocation2 + $0x1c0] sm:$0xff]   ;;  %v2000_v37 = vld [vmem:[#allocation2 + $0x1c8] sm:$0xff]  }
 0x579   :  { %v773_v39 = vmul.f32 0.0625, %v772_v38  ;;  %v2001_v38 = vld [vmem:[#allocation2 + $0x1d0] sm:$0xff]  }
 0x57b   :  { %v776_v40 = vadd.f32 1e-05, %v773_v39  ;;  %v2002_v39 = vld [vmem:[#allocation2 + $0x1d8] sm:$0xff]  }
 0x57d   :  { %2031 = vrsqrt.f32 %v776_v40  ;;  %v2003_v40 = vld [vmem:[#allocation2 + $0x1e0] sm:$0xff]  }
 0x587   :  { %v2032_v42 = vpop.eup %2031 }
 0x588   :  { %v778_v43 = vmul.f32 %v2032_v42, %v1589_v41  ;;  %v2004_v41 = vld [vmem:[#allocation2 + $0x1e8] sm:$0xff]   ;;  %v2005_v42 = vld [vmem:[#allocation2 + $0x1f0] sm:$0xff]  }
 0x58a   :  { %v783_v44 = vrot.slane %v778_v43, %v2177_v48  ;;  %v2006_v43 = vld [vmem:[#allocation2 + $0x1f8] sm:$0xff]  }
 0x58c   :  { %v785_v46 = vmul.f32 %v783_v44, %v762_v28  ;;  %v786_v47 = vmul.f32 %v783_v44, %v763_v29  ;;  %v1602_v28 = vld [vmem:[%s2357_s3 + $0x5] ss:$0 sm:$0xff] }
 0x58e   :  { %v795_v49 = vadd.f32 %v1591_v45, %v785_v46  ;;  %v796_v50 = vadd.f32 %v1591_v45, %v786_v47 }
 0x590   :  { %v797_v51 = vmax.f32 %v795_v49, 0.0  ;;  %v798_v52 = vmax.f32 %v796_v50, 0.0 }
 0x592   :  { %v799_v53 = vpack.c.bf16 %v798_v52, %v797_v51 }
 0x594   :  { %1852 = vmatmul.mubr.bf16.vlgmr.msra.gmra.mrb[8].mxu1 %v799_v53 }
 0x595   :  { %1891 = vmatprep.mubr.msk.bf16.mxu1 %vm2093_vm0, %v2092_v0  ;;  %1876 = vmatpush3.bf16.msra.mxu1 %v1999_v36 }
 0x596   :  { %1877 = vmatprep.subr.bf16.mxu1 %v2092_v0 }
 0x599   :  { %1878 = vmatpush3.bf16.msra.mxu1 %v2000_v37 }
 0x59a   :  { %1879 = vmatprep.subr.bf16.mxu1 %v2092_v0 }
 0x59d   :  { %1880 = vmatpush3.bf16.msra.mxu1 %v2001_v38 }
 0x59e   :  { %1881 = vmatprep.subr.bf16.mxu1 %v2092_v0 }
 0x5a1   :  { %1882 = vmatpush3.bf16.msra.mxu1 %v2002_v39 }
 0x5a2   :  { %1883 = vmatprep.subr.bf16.mxu1 %v2092_v0 }
 0x5a5   :  { %1884 = vmatpush3.bf16.msra.mxu1 %v2003_v40 }
 0x5a6   :  { %1885 = vmatprep.subr.bf16.mxu1 %v2092_v0 }
 0x5a9   :  { %1886 = vmatpush3.bf16.msra.mxu1 %v2004_v41 }
 0x5aa   :  { %1887 = vmatprep.subr.bf16.mxu1 %v2092_v0 }
 0x5ad   :  { %1888 = vmatpush3.bf16.msra.mxu1 %v2005_v42 }
 0x5ae   :  { %1889 = vmatprep.subr.bf16.mxu1 %v2092_v0 }
 0x5b1   :  { %1890 = vmatpush3.bf16.msra.mxu1 %v2006_v43 }
 0x5b2   :  { %1915 = vmatprep.subr.bf16.mxu1 %v2092_v0 }
 0x667   :  { %v899_v62 = vpop.f32.mrb[8].mxu1 }
 0x668   :  { %v1853_v63 = vpop.f32.mrb[9].mxu1 }
 0x669   :  { %v902_v1 = vpop.f32.mrb[10].mxu1 }
 0x66a   :  { %v906_v2 = vadd.f32 %v902_v1, %v899_v62  ;;  %v1854_v3 = vpop.f32.mrb[11].mxu1 }
 0x66c   :  { %v907_v4 = vrot.slane %v906_v2, 4 }
 0x66e   :  { %v908_v5 = vadd.f32 %v907_v4, %v906_v2 }
 0x670   :  { %v909_v6 = vrot.slane %v908_v5, 2 }
 0x672   :  { %v910_v7 = vadd.f32 %v909_v6, %v908_v5 }
 0x674   :  { %v911_v8 = vrot.slane %v910_v7, 1 }
 0x676   :  { %v912_v9 = vadd.f32 %v911_v8, %v910_v7  ;;  %v1611_v7 = vld [vmem:[%s2356_s2 + $0x6] sm:$0x1] }
 0x678   :  { %v913_v10 = vmul.f32 0.0625, %v912_v9 }
 0x67a   :  { %v914_v11 = vsub.f32 %v899_v62, %v913_v10  ;;  %v915_v12 = vsub.f32 %v902_v1, %v913_v10 }
 0x67c   :  { %v916_v13 = vmul.f32 %v914_v11, %v914_v11  ;;  %v917_v14 = vmul.f32 %v915_v12, %v915_v12 }
 0x67e   :  { %v918_v15 = vadd.f32 %v917_v14, %v916_v13 }
 0x680   :  { %v919_v16 = vrot.slane %v918_v15, 4 }
 0x682   :  { %v920_v17 = vadd.f32 %v919_v16, %v918_v15 }
 0x684   :  { %v921_v18 = vrot.slane %v920_v17, 2 }
 0x686   :  { %v922_v19 = vadd.f32 %v921_v18, %v920_v17 }
 0x688   :  { %v923_v20 = vrot.slane %v922_v19, 1 }
 0x68a   :  { %v924_v21 = vadd.f32 %v923_v20, %v922_v19  ;;  %v2007_v19 = vld [vmem:[#allocation2 + $0x200] sm:$0xff]   ;;  %v2008_v20 = vld [vmem:[#allocation2 + $0x208] sm:$0xff]  }
 0x68c   :  { %v925_v22 = vmul.f32 0.0625, %v924_v21  ;;  %v2009_v21 = vld [vmem:[#allocation2 + $0x210] sm:$0xff]  }
 0x68e   :  { %v928_v23 = vadd.f32 1e-05, %v925_v22  ;;  %v2010_v22 = vld [vmem:[#allocation2 + $0x218] sm:$0xff]  }
 0x690   :  { %2033 = vrsqrt.f32 %v928_v23  ;;  %v2011_v23 = vld [vmem:[#allocation2 + $0x220] sm:$0xff]  }
 0x69a   :  { %v2034_v25 = vpop.eup %2033 }
 0x69b   :  { %v930_v26 = vmul.f32 %v2034_v25, %v1600_v24  ;;  %v2012_v24 = vld [vmem:[#allocation2 + $0x228] sm:$0xff]   ;;  %v2013_v25 = vld [vmem:[#allocation2 + $0x230] sm:$0xff]  }
 0x69d   :  { %v935_v27 = vrot.slane %v930_v26, %v2177_v48  ;;  %v2014_v26 = vld [vmem:[#allocation2 + $0x238] sm:$0xff]  }
 0x69f   :  { %v937_v29 = vmul.f32 %v935_v27, %v914_v11  ;;  %v938_v30 = vmul.f32 %v935_v27, %v915_v12  ;;  %v1613_v11 = vld [vmem:[%s2357_s3 + $0x6] ss:$0 sm:$0xff] }
 0x6a1   :  { %v947_v31 = vadd.f32 %v1602_v28, %v937_v29  ;;  %v948_v32 = vadd.f32 %v1602_v28, %v938_v30 }
 0x6a3   :  { %v949_v33 = vmax.f32 %v947_v31, 0.0  ;;  %v950_v34 = vmax.f32 %v948_v32, 0.0 }
 0x6a5   :  { %v951_v35 = vpack.c.bf16 %v950_v34, %v949_v33 }
 0x6a7   :  { %1872 = vmatmul.mubr.bf16.vlgmr.msra.gmra.mrb[12].mxu0 %v951_v35 }
 0x6a8   :  { %1911 = vmatprep.mubr.msk.bf16.mxu0 %vm2093_vm0, %v2092_v0  ;;  %1896 = vmatpush3.bf16.msra.mxu0 %v2007_v19 }
 0x6a9   :  { %1897 = vmatprep.subr.bf16.mxu0 %v2092_v0 }
 0x6ac   :  { %1898 = vmatpush3.bf16.msra.mxu0 %v2008_v20 }
 0x6ad   :  { %1899 = vmatprep.subr.bf16.mxu0 %v2092_v0 }
 0x6b0   :  { %1900 = vmatpush3.bf16.msra.mxu0 %v2009_v21 }
 0x6b1   :  { %1901 = vmatprep.subr.bf16.mxu0 %v2092_v0 }
 0x6b4   :  { %1902 = vmatpush3.bf16.msra.mxu0 %v2010_v22 }
 0x6b5   :  { %1903 = vmatprep.subr.bf16.mxu0 %v2092_v0 }
 0x6b8   :  { %1904 = vmatpush3.bf16.msra.mxu0 %v2011_v23 }
 0x6b9   :  { %1905 = vmatprep.subr.bf16.mxu0 %v2092_v0 }
 0x6bc   :  { %1906 = vmatpush3.bf16.msra.mxu0 %v2012_v24 }
 0x6bd   :  { %1907 = vmatprep.subr.bf16.mxu0 %v2092_v0 }
 0x6c0   :  { %1908 = vmatpush3.bf16.msra.mxu0 %v2013_v25 }
 0x6c1   :  { %1909 = vmatprep.subr.bf16.mxu0 %v2092_v0 }
 0x6c4   :  { %1910 = vmatpush3.bf16.msra.mxu0 %v2014_v26 }
 0x77a   :  { %v1051_v44 = vpop.f32.mrb[12].mxu0 }
 0x77b   :  { %v1873_v45 = vpop.f32.mrb[13].mxu0 }
 0x77c   :  { %v1054_v46 = vpop.f32.mrb[14].mxu0 }
 0x77d   :  { %v1058_v47 = vadd.f32 %v1054_v46, %v1051_v44  ;;  %v1874_v49 = vpop.f32.mrb[15].mxu0 }
 0x77f   :  { %v1059_v50 = vrot.slane %v1058_v47, 4 }
 0x781   :  { %v1060_v51 = vadd.f32 %v1059_v50, %v1058_v47 }
 0x783   :  { %v1061_v52 = vrot.slane %v1060_v51, 2 }
 0x785   :  { %v1062_v53 = vadd.f32 %v1061_v52, %v1060_v51 }
 0x787   :  { %v1063_v54 = vrot.slane %v1062_v53, 1 }
 0x789   :  { %v1064_v55 = vadd.f32 %v1063_v54, %v1062_v53  ;;  %v1622_v53 = vld [vmem:[%s2356_s2 + $0x7] sm:$0x1] }
 0x78b   :  { %v1065_v56 = vmul.f32 0.0625, %v1064_v55 }
 0x78d   :  { %v1066_v57 = vsub.f32 %v1051_v44, %v1065_v56  ;;  %v1067_v58 = vsub.f32 %v1054_v46, %v1065_v56 }
 0x78f   :  { %v1068_v59 = vmul.f32 %v1066_v57, %v1066_v57  ;;  %v1069_v60 = vmul.f32 %v1067_v58, %v1067_v58 }
 0x791   :  { %v1070_v61 = vadd.f32 %v1069_v60, %v1068_v59 }
 0x793   :  { %v1071_v62 = vrot.slane %v1070_v61, 4 }
 0x795   :  { %v1072_v63 = vadd.f32 %v1071_v62, %v1070_v61 }
 0x797   :  { %v1073_v1 = vrot.slane %v1072_v63, 2 }
 0x799   :  { %v1074_v2 = vadd.f32 %v1073_v1, %v1072_v63 }
 0x79b   :  { %v1075_v3 = vrot.slane %v1074_v2, 1 }
 0x79d   :  { %v1076_v4 = vadd.f32 %v1075_v3, %v1074_v2  ;;  %v2015_v2 = vld [vmem:[%s2358_s4] sm:$0xff]   ;;  %v2016_v3 = vld [vmem:[%s2358_s4 + $0x8] sm:$0xff]  }
 0x79f   :  { %v1077_v5 = vmul.f32 0.0625, %v1076_v4  ;;  %v2017_v4 = vld [vmem:[%s2358_s4 + $0x10] sm:$0xff]  }
 0x7a1   :  { %v1080_v6 = vadd.f32 1e-05, %v1077_v5  ;;  %v2018_v5 = vld [vmem:[%s2358_s4 + $0x18] sm:$0xff]  }
 0x7a3   :  { %2035 = vrsqrt.f32 %v1080_v6  ;;  %v2019_v6 = vld [vmem:[%s2358_s4 + $0x20] sm:$0xff]  }
 0x7ad   :  { %v2036_v8 = vpop.eup %2035 }
 0x7ae   :  { %v1082_v9 = vmul.f32 %v2036_v8, %v1611_v7  ;;  %v2020_v7 = vld [vmem:[%s2358_s4 + $0x28] sm:$0xff]   ;;  %v2021_v8 = vld [vmem:[%s2358_s4 + $0x30] sm:$0xff]  }
 0x7b0   :  { %v1087_v10 = vrot.slane %v1082_v9, %v2177_v48  ;;  %v2022_v9 = vld [vmem:[%s2358_s4 + $0x38] sm:$0xff]  }
 0x7b2   :  { %v1089_v12 = vmul.f32 %v1087_v10, %v1066_v57  ;;  %v1090_v13 = vmul.f32 %v1087_v10, %v1067_v58  ;;  %v1624_v57 = vld [vmem:[%s2357_s3 + $0x7] ss:$0 sm:$0xff] }
 0x7b4   :  { %v1099_v14 = vadd.f32 %v1613_v11, %v1089_v12  ;;  %v1100_v15 = vadd.f32 %v1613_v11, %v1090_v13 }
 0x7b6   :  { %v1101_v16 = vmax.f32 %v1099_v14, 0.0  ;;  %v1102_v17 = vmax.f32 %v1100_v15, 0.0 }
 0x7b8   :  { %v1103_v18 = vpack.c.bf16 %v1102_v17, %v1101_v16 }
 0x7ba   :  { %1892 = vmatmul.mubr.bf16.vlgmr.msra.gmra.mrb[12].mxu1 %v1103_v18 }
 0x7bb   :  { %1931 = vmatprep.mubr.msk.bf16.mxu1 %vm2093_vm0, %v2092_v0  ;;  %1916 = vmatpush3.bf16.msra.mxu1 %v2015_v2 }
 0x7bc   :  { %1917 = vmatprep.subr.bf16.mxu1 %v2092_v0 }
 0x7bf   :  { %1918 = vmatpush3.bf16.msra.mxu1 %v2016_v3 }
 0x7c0   :  { %1919 = vmatprep.subr.bf16.mxu1 %v2092_v0 }
 0x7c3   :  { %1920 = vmatpush3.bf16.msra.mxu1 %v2017_v4 }
 0x7c4   :  { %1921 = vmatprep.subr.bf16.mxu1 %v2092_v0 }
 0x7c7   :  { %1922 = vmatpush3.bf16.msra.mxu1 %v2018_v5 }
 0x7c8   :  { %1923 = vmatprep.subr.bf16.mxu1 %v2092_v0 }
 0x7cb   :  { %1924 = vmatpush3.bf16.msra.mxu1 %v2019_v6 }
 0x7cc   :  { %1925 = vmatprep.subr.bf16.mxu1 %v2092_v0 }
 0x7cf   :  { %1926 = vmatpush3.bf16.msra.mxu1 %v2020_v7 }
 0x7d0   :  { %1927 = vmatprep.subr.bf16.mxu1 %v2092_v0 }
 0x7d3   :  { %1928 = vmatpush3.bf16.msra.mxu1 %v2021_v8 }
 0x7d4   :  { %1929 = vmatprep.subr.bf16.mxu1 %v2092_v0 }
 0x7d7   :  { %1930 = vmatpush3.bf16.msra.mxu1 %v2022_v9 }
 0x88d   :  { %v1203_v27 = vpop.f32.mrb[12].mxu1 }
 0x88e   :  { %v1893_v28 = vpop.f32.mrb[13].mxu1 }
 0x88f   :  { %v1206_v29 = vpop.f32.mrb[14].mxu1 }
 0x890   :  { %v1210_v30 = vadd.f32 %v1206_v29, %v1203_v27  ;;  %v1894_v31 = vpop.f32.mrb[15].mxu1 }
 0x892   :  { %v1211_v32 = vrot.slane %v1210_v30, 4 }
 0x894   :  { %v1212_v33 = vadd.f32 %v1211_v32, %v1210_v30 }
 0x896   :  { %v1213_v34 = vrot.slane %v1212_v33, 2 }
 0x898   :  { %v1214_v35 = vadd.f32 %v1213_v34, %v1212_v33  ;;  %v1633_v34 = vld [vmem:[%s2356_s2 + $0x8] sm:$0x1]  ;;  %s2094_s2 = smov [#allocation5]  }
 0x899   :  { %s1527_s14 = sshll.u32 %s2094_s2, 4  ;;  %s1528_s14 = int_to_ptr.vmem [resolvable:$true] %s1527_s14 }
 0x89a   :  { %v1215_v36 = vrot.slane %v1214_v35, 1  ;;  %p2068_p9 = scmp.lt.s32.totalorder %s1528_s14, %s1528_s14 }
 0x89c   :  { %v1216_v37 = vadd.f32 %v1215_v36, %v1214_v35 }
 0x89e   :  { %v1217_v38 = vmul.f32 0.0625, %v1216_v37 }
 0x8a0   :  { %v1218_v39 = vsub.f32 %v1203_v27, %v1217_v38  ;;  %v1219_v40 = vsub.f32 %v1206_v29, %v1217_v38  ;;  %v1635_v38 = vld [vmem:[%s2357_s3 + $0x8] ss:$0 sm:$0xff]  ;;  %s2063_s3 = scalar_lea.vmem %s1528_s14, 256 }
 0x8a1   :  { %p2064_p8 = scmp.ne.s32.totalorder %s1528_s14, %s2063_s3  ;;  %p2069_p10 = scmp.lt.s32.totalorder %s2063_s3, %s2063_s3 }
 0x8a2   :  { %v1220_v41 = vmul.f32 %v1218_v39, %v1218_v39  ;;  %v1221_v42 = vmul.f32 %v1219_v40, %v1219_v40 }
 0x8a3   :  { %p2070_p11 = por %p2069_p10, %p2068_p9 }
 0x8a4   :  { %v1222_v43 = vadd.f32 %v1221_v42, %v1220_v41 }
 0x8a5   :  { %p2071_p12 = pnand %p2070_p11, %p2064_p8 }
 0x8a6   :  { %v1223_v44 = vrot.slane %v1222_v43, 4 }
 0x8a8   :  { %v1224_v45 = vadd.f32 %v1223_v44, %v1222_v43 }
 0x8aa   :  { %v1225_v46 = vrot.slane %v1224_v45, 2 }
 0x8ac   :  { %v1226_v47 = vadd.f32 %v1225_v46, %v1224_v45  ;;  %v1636_v46 = vld [vmem:[%s2359_s5] ss:$0 sm:$0xff] }
 0x8ae   :  { %v1227_v49 = vrot.slane %v1226_v47, 1 }
 0x8b0   :  { %v1228_v50 = vadd.f32 %v1227_v49, %v1226_v47 }
 0x8b2   :  { %v1229_v51 = vmul.f32 0.0625, %v1228_v50 }
 0x8b4   :  { %v1232_v52 = vadd.f32 1e-05, %v1229_v51 }
 0x8b6   :  { %2037 = vrsqrt.f32 %v1232_v52 }
 0x8c0   :  { %v2038_v54 = vpop.eup %2037 }
 0x8c1   :  { %v1234_v55 = vmul.f32 %v2038_v54, %v1622_v53 }
 0x8c3   :  { %v1239_v56 = vrot.slane %v1234_v55, %v2177_v48 }
 0x8c5   :  { %v1241_v58 = vmul.f32 %v1239_v56, %v1218_v39  ;;  %v1242_v59 = vmul.f32 %v1239_v56, %v1219_v40 }
 0x8c7   :  { %v1251_v60 = vadd.f32 %v1624_v57, %v1241_v58  ;;  %v1252_v61 = vadd.f32 %v1624_v57, %v1242_v59 }
 0x8c9   :  { %v1253_v62 = vmax.f32 %v1251_v60, 0.0  ;;  %v1254_v63 = vmax.f32 %v1252_v61, 0.0 }
 0x8cb   :  { %v1255_v1 = vpack.c.bf16 %v1254_v63, %v1253_v62 }
 0x8cd   :  { %1912 = vmatmul.mubr.bf16.vlgmr.msra.gmra.mrb[16].mxu0 %v1255_v1 }
 0x9a0   :  { %v1355_v10 = vpop.f32.mrb[16].mxu0 }
 0x9a1   :  { %v1913_v11 = vpop.f32.mrb[17].mxu0 }
 0x9a2   :  { %v1358_v12 = vpop.f32.mrb[18].mxu0 }
 0x9a3   :  { %v1362_v13 = vadd.f32 %v1358_v12, %v1355_v10  ;;  %v1914_v14 = vpop.f32.mrb[19].mxu0 }
 0x9a5   :  { %v1363_v15 = vrot.slane %v1362_v13, 4 }
 0x9a7   :  { %v1364_v16 = vadd.f32 %v1363_v15, %v1362_v13 }
 0x9a9   :  { %v1365_v17 = vrot.slane %v1364_v16, 2 }
 0x9ab   :  { %v1366_v18 = vadd.f32 %v1365_v17, %v1364_v16 }
 0x9ad   :  { %v1367_v19 = vrot.slane %v1366_v18, 1 }
 0x9af   :  { %v1368_v20 = vadd.f32 %v1367_v19, %v1366_v18 }
 0x9b1   :  { %v1369_v21 = vmul.f32 0.0625, %v1368_v20 }
 0x9b3   :  { %v1370_v22 = vsub.f32 %v1355_v10, %v1369_v21  ;;  %v1371_v23 = vsub.f32 %v1358_v12, %v1369_v21 }
 0x9b5   :  { %v1372_v0 = vmul.f32 %v1370_v22, %v1370_v22  ;;  %v1373_v24 = vmul.f32 %v1371_v23, %v1371_v23 }
 0x9b7   :  { %v1374_v25 = vadd.f32 %v1373_v24, %v1372_v0 }
 0x9b9   :  { %v1375_v26 = vrot.slane %v1374_v25, 4 }
 0x9bb   :  { %v1376_v27 = vadd.f32 %v1375_v26, %v1374_v25 }
 0x9bd   :  { %v1377_v28 = vrot.slane %v1376_v27, 2 }
 0x9bf   :  { %v1378_v29 = vadd.f32 %v1377_v28, %v1376_v27 }
 0x9c1   :  { %v1379_v30 = vrot.slane %v1378_v29, 1 }
 0x9c3   :  { %v1380_v31 = vadd.f32 %v1379_v30, %v1378_v29 }
 0x9c5   :  { %v1381_v32 = vmul.f32 0.0625, %v1380_v31 }
 0x9c7   :  { %v1384_v33 = vadd.f32 1e-05, %v1381_v32 }
 0x9c9   :  { %2039 = vrsqrt.f32 %v1384_v33 }
 0x9d3   :  { %v2040_v35 = vpop.eup %2039 }
 0x9d4   :  { %v1386_v36 = vmul.f32 %v2040_v35, %v1633_v34 }
 0x9d6   :  { %v1391_v37 = vrot.slane %v1386_v36, %v2177_v48 }
 0x9d8   :  { %v1393_v39 = vmul.f32 %v1391_v37, %v1370_v22  ;;  %v1394_v40 = vmul.f32 %v1391_v37, %v1371_v23 }
 0x9da   :  { %v1403_v41 = vadd.f32 %v1635_v38, %v1393_v39  ;;  %v1404_v42 = vadd.f32 %v1635_v38, %v1394_v40 }
 0x9dc   :  { %v1405_v43 = vmax.f32 %v1403_v41, 0.0  ;;  %v1406_v44 = vmax.f32 %v1404_v42, 0.0 }
 0x9de   :  { %v1407_v45 = vpack.c.bf16 %v1406_v44, %v1405_v43 }
 0x9e0   :  { %1932 = vmatmul.mubr.bf16.vlgmr.msra.gmra.mrb[16].mxu1 %v1407_v45 }
 0xab3   :  { %v1513_v47 = vpop.f32.mrb[16].mxu1 }
 0xab4   :  { %v1514_v48 = vadd.f32 %v1636_v46, %v1513_v47  ;;  %v1933_v49 = vpop.f32.mrb[17].mxu1 }
 0xab5   :  { %v1516_v50 = vpop.f32.mrb[18].mxu1 }
 0xab6   :  { %1520 = vst [vmem:[#allocation5] sm:$0xff] %v1514_v48  ;;  %v1517_v51 = vadd.f32 %v1636_v46, %v1516_v50  ;;  %v1934_v52 = vpop.f32.mrb[19].mxu1 }
 0xab8   :  { %1521 = vst [vmem:[#allocation5 + $0x8] sm:$0xff] %v1517_v51 }
 0xab9   :  { %2074 = shalt.err (!%p2071_p12)
}
 0xaba   :  { %s2075_s16 = scalar_lea.hbm %s2360_s6, 256 }
 0xabb   :  { %p2076_p13 = scmp.ne.s32.totalorder %s2360_s6, %s2075_s16  ;;  %p2079_p0 = scmp.lt.u32.totalorder %s2075_s16, %s2360_s6 }
 0xabd   :  { %p2081_p1 = pnand %p2079_p0, %p2076_p13 }
 0xabf   :  { %2084 = shalt.err (!%p2081_p1)
}
 0xac0   :  { %s2095_s21 = smov 128   ;;  %s2096_s22 = smov 8  }
 0xac1   :  { %1533 = dma.vmem_to_hbm [thread:$0]  %s1528_s14, 256, %s2360_s6, [#allocation4], %s2095_s21, %s2095_s21, %s2096_s22  }
 0xac2   :  { %2087 = dma.done.wait [#allocation4], 256  }
 0xac3   :  { %2088 = vsyncadd [#allocation4], 4294967040 }
 0xac4   :  { %1537 = vsyncpa [#allocation3], 1 }
 0xac5   :  { %1538 = vsyncpa [#allocation4], 1 }

</bundles_post_ra>
